<compile_context>
chip_gen: v7x
topology: tpu7x:2x2x1
jax: 0.10.0
libtpu: 0.0.40
codegen_flags: <defaults>
</compile_context>

<pallas_src>
import jax
import jax.numpy as jnp
from jax import lax
from jax.experimental import pallas as pl
from jax.experimental.pallas import tpu as pltpu


# ---------------------------------------------------------------------------
# Kernel
# ---------------------------------------------------------------------------

def _make_kernel(tb, sh1):
    f32 = jnp.float32
    bf16 = jnp.bfloat16

    def kernel(x_ref, wc1_ref, pc1_ref, w2_ref, csum_ref, gexp_ref,
               w1_ref, wfc2_ref, sew_ref, bias_ref, o_ref):
        # x_ref: [28*tb, 28], slab row = r*tb + b (image row r, image b within tile).
        x = x_ref[...]
        zr = jnp.zeros((tb, 28), bf16)
        x1 = jnp.concatenate([x[tb:], zr], axis=0)                 # image row r+1
        x2 = jnp.concatenate([x[2 * tb:], zr, zr], axis=0)         # image row r+2
        cat1 = jnp.concatenate([x, x1, x2], axis=1)                # [28*tb, 84]

        # BinaryConv2d(3x3) + BN1 + ReLU (binarization + BN scale folded into wc1).
        a1 = jnp.dot(cat1[:26 * tb], wc1_ref[...], preferred_element_type=f32)
        a1 = jnp.maximum(a1 + sh1, 0.0)                            # [26*tb, 26]

        # AvgPool(2,2): row pairs via static group slices, col pairs via pc1 (0.25).
        pe = jnp.concatenate(
            [a1[(2 * i) * tb:(2 * i + 1) * tb] + a1[(2 * i + 1) * tb:(2 * i + 2) * tb]
             for i in range(13)], axis=0)                          # [13*tb, 26]
        y1 = jnp.dot(pe.astype(bf16), pc1_ref[...],
                     preferred_element_type=f32)                   # [13*tb, 13]

        # Conv2d(1->8, 3x3, pad=1) + BN2 + ReLU.  Row taps are whole-group shifts; the
        # zero fill at the slab edges is exactly the zero padding (rows -1 / 13).
        z13 = jnp.zeros((tb, 13), f32)
        ym = jnp.concatenate([z13, y1[:12 * tb]], axis=0)          # image row i-1
        yp = jnp.concatenate([y1[tb:], z13], axis=0)               # image row i+1
        cat2 = jnp.concatenate([ym, y1, yp], axis=1).astype(bf16)  # [13*tb, 39]
        a2 = jnp.dot(cat2, w2_ref[...], preferred_element_type=f32)   # [13*tb, 104]
        a2 = jnp.maximum(a2 + bias_ref[0:1, 0:104], 0.0)           # BN2 shift + ReLU

        # SE block: global average pool -> 1x1 -> ReLU -> 1x1 -> Hardsigmoid.
        rs = jnp.dot(a2, csum_ref[...], preferred_element_type=f32)   # [13*tb, 8]
        s8 = rs[0:tb]
        for i in range(1, 13):                                     # per-image row reduce
            s8 = s8 + rs[i * tb:(i + 1) * tb]
        s8 = s8 * (1.0 / 169.0)                                    # [tb, 8]
        sew = sew_ref[...]
        h = jnp.maximum(jnp.dot(s8, sew[:, 0:4], preferred_element_type=f32)
                        + bias_ref[1:2, 0:4], 0.0)                 # [tb, 4]
        g = jnp.dot(h, sew[0:4, 4:12], preferred_element_type=f32) + bias_ref[2:3, 0:8]
        g = jnp.clip(g * (1.0 / 6.0) + 0.5, 0.0, 1.0)              # Hardsigmoid, [tb, 8]

        # MaxPool(2,2) (floor: map row/col 12 dropped) + flatten into lanes.
        blks = [jnp.maximum(a2[(2 * i) * tb:(2 * i + 1) * tb],
                            a2[(2 * i + 1) * tb:(2 * i + 2) * tb]) for i in range(6)]
        rmax = jnp.concatenate(blks, axis=1)                       # [tb, 624]
        cshift = jnp.concatenate([rmax[:, 1:], jnp.zeros((tb, 1), f32)], axis=1)
        flat = jnp.maximum(rmax, cshift)          # pooled value at lane i*104 + c*13 + 2j
        # SE gate post-pool (exact: gate >= 0, constant per (image, channel)).
        flat = flat * jnp.dot(g, gexp_ref[...], preferred_element_type=f32)

        # fc head (NCHW flatten + pooled-lane selection folded into w1); Dropout = id (eval).
        h1 = jnp.maximum(jnp.dot(flat, w1_ref[...], preferred_element_type=f32)
                         + bias_ref[3:4, 0:64], 0.0)               # [tb, 64]
        o_ref[...] = jnp.dot(h1, wfc2_ref[...], preferred_element_type=f32) + bias_ref[4:5, :]

    return kernel


# ---------------------------------------------------------------------------
# One-time parameter folding (all constants are batch-tile independent)
# ---------------------------------------------------------------------------

def _fold_params(params):
    eps = 1e-5
    f32 = jnp.float32
    bf16 = jnp.bfloat16

    # ---- stage 1: binarize conv1, fold BN1 scale into the column-tap matrix ----
    s1 = float(params['bn1_gamma'][0]) / float(jnp.sqrt(params['bn1_var'][0] + eps))
    sh1 = (float(params['bn1_beta'][0]) - float(params['bn1_mean'][0]) * s1
           + s1 * float(params['conv1_b'][0]))
    wb = (params['conv1_w'].reshape(3, 3) > 0).astype(f32) * s1
    cin = jnp.arange(28)[:, None]
    cout = jnp.arange(26)[None, :]
    taps = []
    for di in range(3):
        m = jnp.zeros((28, 26), f32)
        for dj in range(3):
            m = m + jnp.where(cin == cout + dj, wb[di, dj], 0.0)
        taps.append(m)
    wc1cat = jnp.concatenate(taps, axis=0)                         # [84, 26], K fused

    rows26 = jnp.arange(26)[:, None]
    cols13 = jnp.arange(13)[None, :]
    pc1q = ((rows26 == 2 * cols13) | (rows26 == 2 * cols13 + 1)).astype(f32) * 0.25  # [26,13]

    # ---- stage 2: fold BN2 scale into conv2; col taps + channel expansion in one matrix ----
    s2 = params['bn2_gamma'] / jnp.sqrt(params['bn2_var'] + eps)
    sh2 = params['bn2_beta'] - params['bn2_mean'] * s2 + s2 * params['conv2_b']
    w2s = params['conv2_w'].reshape(8, 3, 3) * s2[:, None, None]
    kin = jnp.arange(13)[:, None]
    jout = jnp.arange(13)[None, :]
    tblocks = []
    for t in range(3):                                             # t = row tap (di)
        chans = []
        for c in range(8):
            m = jnp.zeros((13, 13), f32)
            for dj in range(3):
                m = m + jnp.where(kin == jout + dj - 1, w2s[c, t, dj], 0.0)
            chans.append(m)
        tblocks.append(jnp.concatenate(chans, axis=1))
    w2cat = jnp.concatenate(tblocks, axis=0)                       # [39, 104], K fused

    # ---- SE reduce / gate-expansion selectors ----
    csum = (jnp.arange(104)[:, None] // 13 == jnp.arange(8)[None, :]).astype(f32)   # [104, 8]
    gexp104 = (jnp.arange(8)[:, None] == (jnp.arange(104)[None, :] // 13)).astype(f32)
    gexp624 = jnp.tile(gexp104, (1, 6))                            # [8, 624]

    # ---- fc head: maxpool lane selection + NCHW flatten folded into fc1 weight ----
    ii, cc, jj = jnp.meshgrid(jnp.arange(6), jnp.arange(8), jnp.arange(6), indexing='ij')
    lanes = (ii * 104 + cc * 13 + 2 * jj).reshape(-1)
    feats = (cc * 36 + ii * 6 + jj).reshape(-1)
    w1fold = jnp.zeros((624, 64), f32).at[lanes].set(params['fc1_w'][:, feats].T)

    wfc2pad = jnp.zeros((64, 128), f32).at[:, :27].set(params['fc2_w'].T)   # lane-dense out

    wse_pack = jnp.zeros((8, 12), f32)
    wse_pack = wse_pack.at[:, 0:4].set(params['se_w1'].reshape(4, 8).T)
    wse_pack = wse_pack.at[0:4, 4:12].set(params['se_w2'].reshape(8, 4).T)

    bias_pack = jnp.zeros((8, 128), f32)
    bias_pack = bias_pack.at[0, 0:104].set(jnp.repeat(sh2, 13))    # BN2 shift per lane
    bias_pack = bias_pack.at[1, 0:4].set(params['se_b1'])
    bias_pack = bias_pack.at[2, 0:8].set(params['se_b2'])
    bias_pack = bias_pack.at[3, 0:64].set(params['fc1_b'])
    bias_pack = bias_pack.at[4, 0:27].set(params['fc2_b'])

    consts = (wc1cat.astype(bf16), pc1q.astype(bf16), w2cat.astype(bf16),
              csum, gexp624, w1fold, wfc2pad, wse_pack, bias_pack)
    return sh1, consts


# ---------------------------------------------------------------------------
# Builder
# ---------------------------------------------------------------------------

def _pick_batch_tile(batch):
    if batch <= 16:
        return batch                      # single grid step; blocks == full array dims
    for t in (64, 32, 16, 8):             # multiple of 8 (sublane alignment), >=2 grid steps
        if batch % t == 0 and batch // t >= 2:
            return t
    return batch


def build_cnn_forward(params, batch, batch_tile=None):
    tb = _pick_batch_tile(batch) if batch_tile is None else batch_tile
    assert batch % tb == 0, "batch must be divisible by the batch tile"
    assert tb == batch or tb % 8 == 0, "batch_tile must be a multiple of 8 (or equal batch)"

    sh1, consts = _fold_params(params)
    kernel = _make_kernel(tb, sh1)

    in_specs = [pl.BlockSpec((28 * tb, 28), lambda i: (i, 0))]
    for arr in consts:
        in_specs.append(pl.BlockSpec(arr.shape, lambda i: (0, 0)))

    flops = 2 * (26 * tb * 84 * 26 + 13 * tb * 26 * 13 + 13 * tb * 39 * 104
                 + 13 * tb * 104 * 8 + tb * 8 * 4 + tb * 4 * 8 + tb * 8 * 624
                 + tb * 624 * 64 + tb * 64 * 128) * (batch // tb)
    bytes_accessed = (batch * 28 * 28 * 2 + batch * 128 * 4
                      + sum(int(c.size) * c.dtype.itemsize for c in consts))

    fused = pl.pallas_call(
        kernel,
        out_shape=jax.ShapeDtypeStruct((batch, 128), jnp.float32),
        grid=(batch // tb,),
        in_specs=in_specs,
        out_specs=pl.BlockSpec((tb, 128), lambda i: (i, 0)),
        compiler_params=pltpu.CompilerParams(dimension_semantics=("parallel",)),
        cost_estimate=pl.CostEstimate(flops=int(flops), transcendentals=0,
                                      bytes_accessed=int(bytes_accessed)),
    )

    @jax.jit
    def forward(x):
        # Rearrange each batch tile to "image-row major, batch innermost" (r*tb + b) and
        # cast to bf16 (halves the HBM read).  NCHW with C=1.
        xb = x.astype(jnp.bfloat16).reshape(batch, 28, 28)
        xb = xb.reshape(batch // tb, tb, 28, 28).transpose(0, 2, 1, 3)
        xb = xb.reshape(batch // tb * 28 * tb, 28)
        return fused(xb, *consts)[:, :27]

    return forward


# ---------------------------------------------------------------------------
# Pure-JAX reference (eval-mode semantics) for verification
# ---------------------------------------------------------------------------

def reference_forward(x, p):
    eps = 1e-5
    dn = ('NCHW', 'OIHW', 'NCHW')

    def bn(y, g, b, m, v):
        sh = (1, -1, 1, 1)
        return (y - m.reshape(sh)) / jnp.sqrt(v.reshape(sh) + eps) * g.reshape(sh) + b.reshape(sh)

    bw = (p['conv1_w'] > 0).astype(jnp.float32)
    y = lax.conv_general_dilated(x, bw, (1, 1), 'VALID', dimension_numbers=dn)
    y = y + p['conv1_b'].reshape(1, -1, 1, 1)
    y = jnp.maximum(bn(y, p['bn1_gamma'], p['bn1_beta'], p['bn1_mean'], p['bn1_var']), 0.0)
    y = lax.reduce_window(y, 0.0, lax.add, (1, 1, 2, 2), (1, 1, 2, 2), 'VALID') * 0.25
    y = lax.conv_general_dilated(y, p['conv2_w'], (1, 1), ((1, 1), (1, 1)), dimension_numbers=dn)
    y = y + p['conv2_b'].reshape(1, -1, 1, 1)
    y = jnp.maximum(bn(y, p['bn2_gamma'], p['bn2_beta'], p['bn2_mean'], p['bn2_var']), 0.0)
    s = jnp.mean(y, axis=(2, 3), keepdims=True)
    h = jnp.maximum(jnp.einsum('oihw,bihw->bo', p['se_w1'], s)[:, :, None, None]
                    + p['se_b1'].reshape(1, -1, 1, 1), 0.0)
    g = jnp.einsum('oihw,bihw->bo', p['se_w2'], h)[:, :, None, None] + p['se_b2'].reshape(1, -1, 1, 1)
    g = jnp.clip(g / 6.0 + 0.5, 0.0, 1.0)
    y = y * g
    y = lax.reduce_window(y, -jnp.inf, lax.max, (1, 1, 2, 2), (1, 1, 2, 2), 'VALID')
    y = y.reshape(y.shape[0], -1)
    y = jnp.maximum(y @ p['fc1_w'].T + p['fc1_b'], 0.0)
    return y @ p['fc2_w'].T + p['fc2_b']


# ---------------------------------------------------------------------------
# Main
# ---------------------------------------------------------------------------

if __name__ == "__main__":
    f32 = jnp.float32
    key = jax.random.PRNGKey(0)
    ks = jax.random.split(key, 21)
    params = {
        'conv1_w': 0.5 * jax.random.normal(ks[0], (1, 1, 3, 3), f32),
        'conv1_b': 0.1 * jax.random.normal(ks[1], (1,), f32),
        'bn1_gamma': 1.0 + 0.1 * jax.random.normal(ks[2], (1,), f32),
        'bn1_beta': 0.1 * jax.random.normal(ks[3], (1,), f32),
        'bn1_mean': 0.1 * jax.random.normal(ks[4], (1,), f32),
        'bn1_var': jax.random.uniform(ks[5], (1,), f32, 0.5, 1.5),
        'conv2_w': 0.3 * jax.random.normal(ks[6], (8, 1, 3, 3), f32),
        'conv2_b': 0.1 * jax.random.normal(ks[7], (8,), f32),
        'bn2_gamma': 1.0 + 0.1 * jax.random.normal(ks[8], (8,), f32),
        'bn2_beta': 0.1 * jax.random.normal(ks[9], (8,), f32),
        'bn2_mean': 0.1 * jax.random.normal(ks[10], (8,), f32),
        'bn2_var': jax.random.uniform(ks[11], (8,), f32, 0.5, 1.5),
        'se_w1': 0.3 * jax.random.normal(ks[12], (4, 8, 1, 1), f32),
        'se_b1': 0.1 * jax.random.normal(ks[13], (4,), f32),
        'se_w2': 0.3 * jax.random.normal(ks[14], (8, 4, 1, 1), f32),
        'se_b2': 0.1 * jax.random.normal(ks[15], (8,), f32),
        'fc1_w': 0.05 * jax.random.normal(ks[16], (64, 288), f32),
        'fc1_b': 0.1 * jax.random.normal(ks[17], (64,), f32),
        'fc2_w': 0.1 * jax.random.normal(ks[18], (27, 64), f32),
        'fc2_b': 0.1 * jax.random.normal(ks[19], (27,), f32),
    }
    x = jax.random.normal(ks[20], (2, 1, 28, 28), f32)

    forward = build_cnn_forward(params, batch=2)
    out = jax.block_until_ready(forward(x))
    assert out.shape == (2, 27), out.shape

    ref = jax.block_until_ready(reference_forward(x, params))
    max_diff = float(jnp.max(jnp.abs(out - ref)))
    # 3e-2 covers the bf16 input / bf16 conv-constant rounding; the SE/FC head stays f32.
    if not bool(jnp.allclose(out, ref, rtol=3e-2, atol=3e-2)):
        raise AssertionError(f"mismatch vs reference, max abs diff = {max_diff}")

    print("KERNEL_OK")
</pallas_src>

<mosaic_0001>
module attributes {stable_mosaic.version = 11 : i64} {
  func.func @kernel(%arg0: i32, %arg1: memref<56x28xbf16, #tpu.memory_space<vmem>>, %arg2: memref<84x26xbf16, #tpu.memory_space<vmem>>, %arg3: memref<26x13xbf16, #tpu.memory_space<vmem>>, %arg4: memref<39x104xbf16, #tpu.memory_space<vmem>>, %arg5: memref<104x8xf32, #tpu.memory_space<vmem>>, %arg6: memref<8x624xf32, #tpu.memory_space<vmem>>, %arg7: memref<624x64xf32, #tpu.memory_space<vmem>>, %arg8: memref<64x128xf32, #tpu.memory_space<vmem>>, %arg9: memref<8x12xf32, #tpu.memory_space<vmem>>, %arg10: memref<8x128xf32, #tpu.memory_space<vmem>>, %arg11: memref<2x128xf32, #tpu.memory_space<vmem>>) attributes {dimension_semantics = [#tpu.dimension_semantics<parallel>], iteration_bounds = array<i64: 1>, scalar_prefetch = 0 : i64, scratch_operands = 0 : i64, tpu.core_type = #tpu.core_type<tc>, window_params = [{transform_indices = @transform_0, window_bounds = array<i64: 56, 28>}, {pipeline_mode = #tpu.pipeline_mode<synchronous>, transform_indices = @transform_1, window_bounds = array<i64: 84, 26>}, {pipeline_mode = #tpu.pipeline_mode<synchronous>, transform_indices = @transform_2, window_bounds = array<i64: 26, 13>}, {pipeline_mode = #tpu.pipeline_mode<synchronous>, transform_indices = @transform_3, window_bounds = array<i64: 39, 104>}, {pipeline_mode = #tpu.pipeline_mode<synchronous>, transform_indices = @transform_4, window_bounds = array<i64: 104, 8>}, {pipeline_mode = #tpu.pipeline_mode<synchronous>, transform_indices = @transform_5, window_bounds = array<i64: 8, 624>}, {pipeline_mode = #tpu.pipeline_mode<synchronous>, transform_indices = @transform_6, window_bounds = array<i64: 624, 64>}, {pipeline_mode = #tpu.pipeline_mode<synchronous>, transform_indices = @transform_7, window_bounds = array<i64: 64, 128>}, {pipeline_mode = #tpu.pipeline_mode<synchronous>, transform_indices = @transform_8, window_bounds = array<i64: 8, 12>}, {pipeline_mode = #tpu.pipeline_mode<synchronous>, transform_indices = @transform_9, window_bounds = array<i64: 8, 128>}, {transform_indices = @transform_10, window_bounds = array<i64: 2, 128>}]} {
    %c0 = arith.constant 0 : index
    %c0_0 = arith.constant 0 : index
    %0 = vector.load %arg1[%c0, %c0_0] : memref<56x28xbf16, #tpu.memory_space<vmem>>, vector<56x28xbf16>
    %cst = arith.constant 0.000000e+00 : bf16
    %1 = vector.broadcast %cst : bf16 to vector<2x28xbf16>
    %2 = vector.extract_strided_slice %0 {offsets = [2, 0], sizes = [54, 28], strides = [1, 1]} : vector<56x28xbf16> to vector<54x28xbf16>
    %3 = tpu.concatenate %2, %1 in 0 : vector<54x28xbf16>, vector<2x28xbf16> -> vector<56x28xbf16>
    %4 = vector.extract_strided_slice %0 {offsets = [4, 0], sizes = [52, 28], strides = [1, 1]} : vector<56x28xbf16> to vector<52x28xbf16>
    %5 = tpu.concatenate %4, %1, %1 in 0 : vector<52x28xbf16>, vector<2x28xbf16>, vector<2x28xbf16> -> vector<56x28xbf16>
    %6 = tpu.concatenate %0, %3, %5 in 1 : vector<56x28xbf16>, vector<56x28xbf16>, vector<56x28xbf16> -> vector<56x84xbf16>
    %7 = vector.extract_strided_slice %6 {offsets = [0, 0], sizes = [52, 84], strides = [1, 1]} : vector<56x84xbf16> to vector<52x84xbf16>
    %c0_1 = arith.constant 0 : index
    %c0_2 = arith.constant 0 : index
    %8 = vector.load %arg2[%c0_1, %c0_2] : memref<84x26xbf16, #tpu.memory_space<vmem>>, vector<84x26xbf16>
    %cst_3 = arith.constant dense<0.000000e+00> : vector<52x26xf32>
    %9 = tpu.matmul %7, %8, %cst_3 {dimension_numbers = #tpu.dot_dimension_numbers<[1], [0], [0], [1], [0, 0, 1, 1], [], []>} : vector<52x84xbf16>, vector<84x26xbf16>, vector<52x26xf32> -> vector<52x26xf32>
    %cst_4 = arith.constant -0.206507668 : f32
    %10 = vector.broadcast %cst_4 : f32 to vector<52x26xf32>
    %11 = arith.addf %9, %10 : vector<52x26xf32>
    %cst_5 = arith.constant 0.000000e+00 : f32
    %12 = vector.broadcast %cst_5 : f32 to vector<52x26xf32>
    %13 = arith.maximumf %11, %12 : vector<52x26xf32>
    %14 = vector.extract_strided_slice %13 {offsets = [0, 0], sizes = [2, 26], strides = [1, 1]} : vector<52x26xf32> to vector<2x26xf32>
    %15 = vector.extract_strided_slice %13 {offsets = [2, 0], sizes = [2, 26], strides = [1, 1]} : vector<52x26xf32> to vector<2x26xf32>
    %16 = arith.addf %14, %15 : vector<2x26xf32>
    %17 = vector.extract_strided_slice %13 {offsets = [4, 0], sizes = [2, 26], strides = [1, 1]} : vector<52x26xf32> to vector<2x26xf32>
    %18 = vector.extract_strided_slice %13 {offsets = [6, 0], sizes = [2, 26], strides = [1, 1]} : vector<52x26xf32> to vector<2x26xf32>
    %19 = arith.addf %17, %18 : vector<2x26xf32>
    %20 = vector.extract_strided_slice %13 {offsets = [8, 0], sizes = [2, 26], strides = [1, 1]} : vector<52x26xf32> to vector<2x26xf32>
    %21 = vector.extract_strided_slice %13 {offsets = [10, 0], sizes = [2, 26], strides = [1, 1]} : vector<52x26xf32> to vector<2x26xf32>
    %22 = arith.addf %20, %21 : vector<2x26xf32>
    %23 = vector.extract_strided_slice %13 {offsets = [12, 0], sizes = [2, 26], strides = [1, 1]} : vector<52x26xf32> to vector<2x26xf32>
    %24 = vector.extract_strided_slice %13 {offsets = [14, 0], sizes = [2, 26], strides = [1, 1]} : vector<52x26xf32> to vector<2x26xf32>
    %25 = arith.addf %23, %24 : vector<2x26xf32>
    %26 = vector.extract_strided_slice %13 {offsets = [16, 0], sizes = [2, 26], strides = [1, 1]} : vector<52x26xf32> to vector<2x26xf32>
    %27 = vector.extract_strided_slice %13 {offsets = [18, 0], sizes = [2, 26], strides = [1, 1]} : vector<52x26xf32> to vector<2x26xf32>
    %28 = arith.addf %26, %27 : vector<2x26xf32>
    %29 = vector.extract_strided_slice %13 {offsets = [20, 0], sizes = [2, 26], strides = [1, 1]} : vector<52x26xf32> to vector<2x26xf32>
    %30 = vector.extract_strided_slice %13 {offsets = [22, 0], sizes = [2, 26], strides = [1, 1]} : vector<52x26xf32> to vector<2x26xf32>
    %31 = arith.addf %29, %30 : vector<2x26xf32>
    %32 = vector.extract_strided_slice %13 {offsets = [24, 0], sizes = [2, 26], strides = [1, 1]} : vector<52x26xf32> to vector<2x26xf32>
    %33 = vector.extract_strided_slice %13 {offsets = [26, 0], sizes = [2, 26], strides = [1, 1]} : vector<52x26xf32> to vector<2x26xf32>
    %34 = arith.addf %32, %33 : vector<2x26xf32>
    %35 = vector.extract_strided_slice %13 {offsets = [28, 0], sizes = [2, 26], strides = [1, 1]} : vector<52x26xf32> to vector<2x26xf32>
    %36 = vector.extract_strided_slice %13 {offsets = [30, 0], sizes = [2, 26], strides = [1, 1]} : vector<52x26xf32> to vector<2x26xf32>
    %37 = arith.addf %35, %36 : vector<2x26xf32>
    %38 = vector.extract_strided_slice %13 {offsets = [32, 0], sizes = [2, 26], strides = [1, 1]} : vector<52x26xf32> to vector<2x26xf32>
    %39 = vector.extract_strided_slice %13 {offsets = [34, 0], sizes = [2, 26], strides = [1, 1]} : vector<52x26xf32> to vector<2x26xf32>
    %40 = arith.addf %38, %39 : vector<2x26xf32>
    %41 = vector.extract_strided_slice %13 {offsets = [36, 0], sizes = [2, 26], strides = [1, 1]} : vector<52x26xf32> to vector<2x26xf32>
    %42 = vector.extract_strided_slice %13 {offsets = [38, 0], sizes = [2, 26], strides = [1, 1]} : vector<52x26xf32> to vector<2x26xf32>
    %43 = arith.addf %41, %42 : vector<2x26xf32>
    %44 = vector.extract_strided_slice %13 {offsets = [40, 0], sizes = [2, 26], strides = [1, 1]} : vector<52x26xf32> to vector<2x26xf32>
    %45 = vector.extract_strided_slice %13 {offsets = [42, 0], sizes = [2, 26], strides = [1, 1]} : vector<52x26xf32> to vector<2x26xf32>
    %46 = arith.addf %44, %45 : vector<2x26xf32>
    %47 = vector.extract_strided_slice %13 {offsets = [44, 0], sizes = [2, 26], strides = [1, 1]} : vector<52x26xf32> to vector<2x26xf32>
    %48 = vector.extract_strided_slice %13 {offsets = [46, 0], sizes = [2, 26], strides = [1, 1]} : vector<52x26xf32> to vector<2x26xf32>
    %49 = arith.addf %47, %48 : vector<2x26xf32>
    %50 = vector.extract_strided_slice %13 {offsets = [48, 0], sizes = [2, 26], strides = [1, 1]} : vector<52x26xf32> to vector<2x26xf32>
    %51 = vector.extract_strided_slice %13 {offsets = [50, 0], sizes = [2, 26], strides = [1, 1]} : vector<52x26xf32> to vector<2x26xf32>
    %52 = arith.addf %50, %51 : vector<2x26xf32>
    %53 = tpu.concatenate %16, %19, %22, %25, %28, %31, %34, %37, %40, %43, %46, %49, %52 in 0 : vector<2x26xf32>, vector<2x26xf32>, vector<2x26xf32>, vector<2x26xf32>, vector<2x26xf32>, vector<2x26xf32>, vector<2x26xf32>, vector<2x26xf32>, vector<2x26xf32>, vector<2x26xf32>, vector<2x26xf32>, vector<2x26xf32>, vector<2x26xf32> -> vector<26x26xf32>
    %54 = arith.truncf %53 : vector<26x26xf32> to vector<26x26xbf16>
    %c0_6 = arith.constant 0 : index
    %c0_7 = arith.constant 0 : index
    %55 = vector.load %arg3[%c0_6, %c0_7] : memref<26x13xbf16, #tpu.memory_space<vmem>>, vector<26x13xbf16>
    %cst_8 = arith.constant dense<0.000000e+00> : vector<26x13xf32>
    %56 = tpu.matmul %54, %55, %cst_8 {dimension_numbers = #tpu.dot_dimension_numbers<[1], [0], [0], [1], [0, 0, 1, 1], [], []>} : vector<26x26xbf16>, vector<26x13xbf16>, vector<26x13xf32> -> vector<26x13xf32>
    %cst_9 = arith.constant 0.000000e+00 : f32
    %57 = vector.broadcast %cst_9 : f32 to vector<2x13xf32>
    %58 = vector.extract_strided_slice %56 {offsets = [0, 0], sizes = [24, 13], strides = [1, 1]} : vector<26x13xf32> to vector<24x13xf32>
    %59 = tpu.concatenate %57, %58 in 0 : vector<2x13xf32>, vector<24x13xf32> -> vector<26x13xf32>
    %60 = vector.extract_strided_slice %56 {offsets = [2, 0], sizes = [24, 13], strides = [1, 1]} : vector<26x13xf32> to vector<24x13xf32>
    %61 = tpu.concatenate %60, %57 in 0 : vector<24x13xf32>, vector<2x13xf32> -> vector<26x13xf32>
    %62 = tpu.concatenate %59, %56, %61 in 1 : vector<26x13xf32>, vector<26x13xf32>, vector<26x13xf32> -> vector<26x39xf32>
    %63 = arith.truncf %62 : vector<26x39xf32> to vector<26x39xbf16>
    %c0_10 = arith.constant 0 : index
    %c0_11 = arith.constant 0 : index
    %64 = vector.load %arg4[%c0_10, %c0_11] : memref<39x104xbf16, #tpu.memory_space<vmem>>, vector<39x104xbf16>
    %cst_12 = arith.constant dense<0.000000e+00> : vector<26x104xf32>
    %65 = tpu.matmul %63, %64, %cst_12 {dimension_numbers = #tpu.dot_dimension_numbers<[1], [0], [0], [1], [0, 0, 1, 1], [], []>} : vector<26x39xbf16>, vector<39x104xbf16>, vector<26x104xf32> -> vector<26x104xf32>
    %c0_13 = arith.constant 0 : index
    %c0_14 = arith.constant 0 : index
    %66 = vector.load %arg10[%c0_13, %c0_14] : memref<8x128xf32, #tpu.memory_space<vmem>>, vector<1x104xf32>
    %67 = vector.broadcast %66 : vector<1x104xf32> to vector<26x104xf32>
    %68 = arith.addf %65, %67 : vector<26x104xf32>
    %cst_15 = arith.constant 0.000000e+00 : f32
    %69 = vector.broadcast %cst_15 : f32 to vector<26x104xf32>
    %70 = arith.maximumf %68, %69 : vector<26x104xf32>
    %c0_16 = arith.constant 0 : index
    %c0_17 = arith.constant 0 : index
    %71 = vector.load %arg5[%c0_16, %c0_17] : memref<104x8xf32, #tpu.memory_space<vmem>>, vector<104x8xf32>
    %cst_18 = arith.constant dense<0.000000e+00> : vector<26x8xf32>
    %72 = tpu.matmul %70, %71, %cst_18 {dimension_numbers = #tpu.dot_dimension_numbers<[1], [0], [0], [1], [0, 0, 1, 1], [], []>} : vector<26x104xf32>, vector<104x8xf32>, vector<26x8xf32> -> vector<26x8xf32>
    %73 = vector.extract_strided_slice %72 {offsets = [0, 0], sizes = [2, 8], strides = [1, 1]} : vector<26x8xf32> to vector<2x8xf32>
    %74 = vector.extract_strided_slice %72 {offsets = [2, 0], sizes = [2, 8], strides = [1, 1]} : vector<26x8xf32> to vector<2x8xf32>
    %75 = arith.addf %73, %74 : vector<2x8xf32>
    %76 = vector.extract_strided_slice %72 {offsets = [4, 0], sizes = [2, 8], strides = [1, 1]} : vector<26x8xf32> to vector<2x8xf32>
    %77 = arith.addf %75, %76 : vector<2x8xf32>
    %78 = vector.extract_strided_slice %72 {offsets = [6, 0], sizes = [2, 8], strides = [1, 1]} : vector<26x8xf32> to vector<2x8xf32>
    %79 = arith.addf %77, %78 : vector<2x8xf32>
    %80 = vector.extract_strided_slice %72 {offsets = [8, 0], sizes = [2, 8], strides = [1, 1]} : vector<26x8xf32> to vector<2x8xf32>
    %81 = arith.addf %79, %80 : vector<2x8xf32>
    %82 = vector.extract_strided_slice %72 {offsets = [10, 0], sizes = [2, 8], strides = [1, 1]} : vector<26x8xf32> to vector<2x8xf32>
    %83 = arith.addf %81, %82 : vector<2x8xf32>
    %84 = vector.extract_strided_slice %72 {offsets = [12, 0], sizes = [2, 8], strides = [1, 1]} : vector<26x8xf32> to vector<2x8xf32>
    %85 = arith.addf %83, %84 : vector<2x8xf32>
    %86 = vector.extract_strided_slice %72 {offsets = [14, 0], sizes = [2, 8], strides = [1, 1]} : vector<26x8xf32> to vector<2x8xf32>
    %87 = arith.addf %85, %86 : vector<2x8xf32>
    %88 = vector.extract_strided_slice %72 {offsets = [16, 0], sizes = [2, 8], strides = [1, 1]} : vector<26x8xf32> to vector<2x8xf32>
    %89 = arith.addf %87, %88 : vector<2x8xf32>
    %90 = vector.extract_strided_slice %72 {offsets = [18, 0], sizes = [2, 8], strides = [1, 1]} : vector<26x8xf32> to vector<2x8xf32>
    %91 = arith.addf %89, %90 : vector<2x8xf32>
    %92 = vector.extract_strided_slice %72 {offsets = [20, 0], sizes = [2, 8], strides = [1, 1]} : vector<26x8xf32> to vector<2x8xf32>
    %93 = arith.addf %91, %92 : vector<2x8xf32>
    %94 = vector.extract_strided_slice %72 {offsets = [22, 0], sizes = [2, 8], strides = [1, 1]} : vector<26x8xf32> to vector<2x8xf32>
    %95 = arith.addf %93, %94 : vector<2x8xf32>
    %96 = vector.extract_strided_slice %72 {offsets = [24, 0], sizes = [2, 8], strides = [1, 1]} : vector<26x8xf32> to vector<2x8xf32>
    %97 = arith.addf %95, %96 : vector<2x8xf32>
    %cst_19 = arith.constant 5.917160e-03 : f32
    %98 = vector.broadcast %cst_19 : f32 to vector<2x8xf32>
    %99 = arith.mulf %97, %98 : vector<2x8xf32>
    %c0_20 = arith.constant 0 : index
    %c0_21 = arith.constant 0 : index
    %100 = vector.load %arg9[%c0_20, %c0_21] : memref<8x12xf32, #tpu.memory_space<vmem>>, vector<8x12xf32>
    %101 = vector.extract_strided_slice %100 {offsets = [0, 0], sizes = [8, 4], strides = [1, 1]} : vector<8x12xf32> to vector<8x4xf32>
    %cst_22 = arith.constant dense<0.000000e+00> : vector<2x4xf32>
    %102 = tpu.matmul %99, %101, %cst_22 {dimension_numbers = #tpu.dot_dimension_numbers<[1], [0], [0], [1], [0, 0, 1, 1], [], []>} : vector<2x8xf32>, vector<8x4xf32>, vector<2x4xf32> -> vector<2x4xf32>
    %c1 = arith.constant 1 : index
    %c0_23 = arith.constant 0 : index
    %103 = vector.load %arg10[%c1, %c0_23] : memref<8x128xf32, #tpu.memory_space<vmem>>, vector<1x4xf32>
    %104 = vector.broadcast %103 : vector<1x4xf32> to vector<2x4xf32>
    %105 = arith.addf %102, %104 : vector<2x4xf32>
    %cst_24 = arith.constant 0.000000e+00 : f32
    %106 = vector.broadcast %cst_24 : f32 to vector<2x4xf32>
    %107 = arith.maximumf %105, %106 : vector<2x4xf32>
    %108 = vector.extract_strided_slice %100 {offsets = [0, 4], sizes = [4, 8], strides = [1, 1]} : vector<8x12xf32> to vector<4x8xf32>
    %cst_25 = arith.constant dense<0.000000e+00> : vector<2x8xf32>
    %109 = tpu.matmul %107, %108, %cst_25 {dimension_numbers = #tpu.dot_dimension_numbers<[1], [0], [0], [1], [0, 0, 1, 1], [], []>} : vector<2x4xf32>, vector<4x8xf32>, vector<2x8xf32> -> vector<2x8xf32>
    %c2 = arith.constant 2 : index
    %c0_26 = arith.constant 0 : index
    %110 = vector.load %arg10[%c2, %c0_26] : memref<8x128xf32, #tpu.memory_space<vmem>>, vector<1x8xf32>
    %111 = vector.broadcast %110 : vector<1x8xf32> to vector<2x8xf32>
    %112 = arith.addf %109, %111 : vector<2x8xf32>
    %cst_27 = arith.constant 0.166666672 : f32
    %113 = vector.broadcast %cst_27 : f32 to vector<2x8xf32>
    %114 = arith.mulf %112, %113 : vector<2x8xf32>
    %cst_28 = arith.constant 5.000000e-01 : f32
    %115 = vector.broadcast %cst_28 : f32 to vector<2x8xf32>
    %116 = arith.addf %114, %115 : vector<2x8xf32>
    %cst_29 = arith.constant 0.000000e+00 : f32
    %cst_30 = arith.constant 1.000000e+00 : f32
    %117 = vector.broadcast %cst_29 : f32 to vector<2x8xf32>
    %118 = arith.maximumf %117, %116 : vector<2x8xf32>
    %119 = vector.broadcast %cst_30 : f32 to vector<2x8xf32>
    %120 = arith.minimumf %119, %118 : vector<2x8xf32>
    %121 = vector.extract_strided_slice %70 {offsets = [0, 0], sizes = [2, 104], strides = [1, 1]} : vector<26x104xf32> to vector<2x104xf32>
    %122 = vector.extract_strided_slice %70 {offsets = [2, 0], sizes = [2, 104], strides = [1, 1]} : vector<26x104xf32> to vector<2x104xf32>
    %123 = arith.maximumf %121, %122 : vector<2x104xf32>
    %124 = vector.extract_strided_slice %70 {offsets = [4, 0], sizes = [2, 104], strides = [1, 1]} : vector<26x104xf32> to vector<2x104xf32>
    %125 = vector.extract_strided_slice %70 {offsets = [6, 0], sizes = [2, 104], strides = [1, 1]} : vector<26x104xf32> to vector<2x104xf32>
    %126 = arith.maximumf %124, %125 : vector<2x104xf32>
    %127 = vector.extract_strided_slice %70 {offsets = [8, 0], sizes = [2, 104], strides = [1, 1]} : vector<26x104xf32> to vector<2x104xf32>
    %128 = vector.extract_strided_slice %70 {offsets = [10, 0], sizes = [2, 104], strides = [1, 1]} : vector<26x104xf32> to vector<2x104xf32>
    %129 = arith.maximumf %127, %128 : vector<2x104xf32>
    %130 = vector.extract_strided_slice %70 {offsets = [12, 0], sizes = [2, 104], strides = [1, 1]} : vector<26x104xf32> to vector<2x104xf32>
    %131 = vector.extract_strided_slice %70 {offsets = [14, 0], sizes = [2, 104], strides = [1, 1]} : vector<26x104xf32> to vector<2x104xf32>
    %132 = arith.maximumf %130, %131 : vector<2x104xf32>
    %133 = vector.extract_strided_slice %70 {offsets = [16, 0], sizes = [2, 104], strides = [1, 1]} : vector<26x104xf32> to vector<2x104xf32>
    %134 = vector.extract_strided_slice %70 {offsets = [18, 0], sizes = [2, 104], strides = [1, 1]} : vector<26x104xf32> to vector<2x104xf32>
    %135 = arith.maximumf %133, %134 : vector<2x104xf32>
    %136 = vector.extract_strided_slice %70 {offsets = [20, 0], sizes = [2, 104], strides = [1, 1]} : vector<26x104xf32> to vector<2x104xf32>
    %137 = vector.extract_strided_slice %70 {offsets = [22, 0], sizes = [2, 104], strides = [1, 1]} : vector<26x104xf32> to vector<2x104xf32>
    %138 = arith.maximumf %136, %137 : vector<2x104xf32>
    %139 = tpu.concatenate %123, %126, %129, %132, %135, %138 in 1 : vector<2x104xf32>, vector<2x104xf32>, vector<2x104xf32>, vector<2x104xf32>, vector<2x104xf32>, vector<2x104xf32> -> vector<2x624xf32>
    %140 = vector.extract_strided_slice %139 {offsets = [0, 1], sizes = [2, 623], strides = [1, 1]} : vector<2x624xf32> to vector<2x623xf32>
    %cst_31 = arith.constant 0.000000e+00 : f32
    %141 = vector.broadcast %cst_31 : f32 to vector<2x1xf32>
    %142 = tpu.concatenate %140, %141 in 1 : vector<2x623xf32>, vector<2x1xf32> -> vector<2x624xf32>
    %143 = arith.maximumf %139, %142 : vector<2x624xf32>
    %c0_32 = arith.constant 0 : index
    %c0_33 = arith.constant 0 : index
    %144 = vector.load %arg6[%c0_32, %c0_33] : memref<8x624xf32, #tpu.memory_space<vmem>>, vector<8x624xf32>
    %cst_34 = arith.constant dense<0.000000e+00> : vector<2x624xf32>
    %145 = tpu.matmul %120, %144, %cst_34 {dimension_numbers = #tpu.dot_dimension_numbers<[1], [0], [0], [1], [0, 0, 1, 1], [], []>} : vector<2x8xf32>, vector<8x624xf32>, vector<2x624xf32> -> vector<2x624xf32>
    %146 = arith.mulf %143, %145 : vector<2x624xf32>
    %c0_35 = arith.constant 0 : index
    %c0_36 = arith.constant 0 : index
    %147 = vector.load %arg7[%c0_35, %c0_36] : memref<624x64xf32, #tpu.memory_space<vmem>>, vector<624x64xf32>
    %cst_37 = arith.constant dense<0.000000e+00> : vector<2x64xf32>
    %148 = tpu.matmul %146, %147, %cst_37 {dimension_numbers = #tpu.dot_dimension_numbers<[1], [0], [0], [1], [0, 0, 1, 1], [], []>} : vector<2x624xf32>, vector<624x64xf32>, vector<2x64xf32> -> vector<2x64xf32>
    %c3 = arith.constant 3 : index
    %c0_38 = arith.constant 0 : index
    %149 = vector.load %arg10[%c3, %c0_38] : memref<8x128xf32, #tpu.memory_space<vmem>>, vector<1x64xf32>
    %150 = vector.broadcast %149 : vector<1x64xf32> to vector<2x64xf32>
    %151 = arith.addf %148, %150 : vector<2x64xf32>
    %cst_39 = arith.constant 0.000000e+00 : f32
    %152 = vector.broadcast %cst_39 : f32 to vector<2x64xf32>
    %153 = arith.maximumf %151, %152 : vector<2x64xf32>
    %c0_40 = arith.constant 0 : index
    %c0_41 = arith.constant 0 : index
    %154 = vector.load %arg8[%c0_40, %c0_41] : memref<64x128xf32, #tpu.memory_space<vmem>>, vector<64x128xf32>
    %cst_42 = arith.constant dense<0.000000e+00> : vector<2x128xf32>
    %155 = tpu.matmul %153, %154, %cst_42 {dimension_numbers = #tpu.dot_dimension_numbers<[1], [0], [0], [1], [0, 0, 1, 1], [], []>} : vector<2x64xf32>, vector<64x128xf32>, vector<2x128xf32> -> vector<2x128xf32>
    %c4 = arith.constant 4 : index
    %c0_43 = arith.constant 0 : index
    %156 = vector.load %arg10[%c4, %c0_43] : memref<8x128xf32, #tpu.memory_space<vmem>>, vector<1x128xf32>
    %157 = vector.broadcast %156 : vector<1x128xf32> to vector<2x128xf32>
    %158 = arith.addf %155, %157 : vector<2x128xf32>
    %c0_44 = arith.constant 0 : index
    %c0_45 = arith.constant 0 : index
    %159 = vector.load %arg11[%c0_44, %c0_45] : memref<2x128xf32, #tpu.memory_space<vmem>>, vector<2x128xf32>
    tpu.vector_store %arg11[%c0_44, %c0_45], %158 {strides = array<i32>} : memref<2x128xf32, #tpu.memory_space<vmem>>, vector<2x128xf32>,
    return
  }
  func.func @transform_0(%arg0: i32) -> (i32, i32) {
    %c0_i32 = arith.constant 0 : i32
    %c0_i32_0 = arith.constant 0 : i32
    return %arg0, %c0_i32 : i32, i32
  }
  func.func @transform_1(%arg0: i32) -> (i32, i32) {
    %c0_i32 = arith.constant 0 : i32
    %c0_i32_0 = arith.constant 0 : i32
    %c0_i32_1 = arith.constant 0 : i32
    return %c0_i32, %c0_i32_0 : i32, i32
  }
  func.func @transform_2(%arg0: i32) -> (i32, i32) {
    %c0_i32 = arith.constant 0 : i32
    %c0_i32_0 = arith.constant 0 : i32
    %c0_i32_1 = arith.constant 0 : i32
    return %c0_i32, %c0_i32_0 : i32, i32
  }
  func.func @transform_3(%arg0: i32) -> (i32, i32) {
    %c0_i32 = arith.constant 0 : i32
    %c0_i32_0 = arith.constant 0 : i32
    %c0_i32_1 = arith.constant 0 : i32
    return %c0_i32, %c0_i32_0 : i32, i32
  }
  func.func @transform_4(%arg0: i32) -> (i32, i32) {
    %c0_i32 = arith.constant 0 : i32
    %c0_i32_0 = arith.constant 0 : i32
    %c0_i32_1 = arith.constant 0 : i32
    return %c0_i32, %c0_i32_0 : i32, i32
  }
  func.func @transform_5(%arg0: i32) -> (i32, i32) {
    %c0_i32 = arith.constant 0 : i32
    %c0_i32_0 = arith.constant 0 : i32
    %c0_i32_1 = arith.constant 0 : i32
    return %c0_i32, %c0_i32_0 : i32, i32
  }
  func.func @transform_6(%arg0: i32) -> (i32, i32) {
    %c0_i32 = arith.constant 0 : i32
    %c0_i32_0 = arith.constant 0 : i32
    %c0_i32_1 = arith.constant 0 : i32
    return %c0_i32, %c0_i32_0 : i32, i32
  }
  func.func @transform_7(%arg0: i32) -> (i32, i32) {
    %c0_i32 = arith.constant 0 : i32
    %c0_i32_0 = arith.constant 0 : i32
    %c0_i32_1 = arith.constant 0 : i32
    return %c0_i32, %c0_i32_0 : i32, i32
  }
  func.func @transform_8(%arg0: i32) -> (i32, i32) {
    %c0_i32 = arith.constant 0 : i32
    %c0_i32_0 = arith.constant 0 : i32
    %c0_i32_1 = arith.constant 0 : i32
    return %c0_i32, %c0_i32_0 : i32, i32
  }
  func.func @transform_9(%arg0: i32) -> (i32, i32) {
    %c0_i32 = arith.constant 0 : i32
    %c0_i32_0 = arith.constant 0 : i32
    %c0_i32_1 = arith.constant 0 : i32
    return %c0_i32, %c0_i32_0 : i32, i32
  }
  func.func @transform_10(%arg0: i32) -> (i32, i32) {
    %c0_i32 = arith.constant 0 : i32
    %c0_i32_0 = arith.constant 0 : i32
    return %arg0, %c0_i32 : i32, i32
  }
}

</mosaic_0001>

<bundles_post_ra>
// kernel: forward.1
= control target key start
LH: loop header
LB: loop body
LE: loop exit
PB: predicated region body
PF: predicated region fallthrough
CT: control target
= control target key end

     0   :  { %15 = vsyncpa [#allocation3], 0  ;;  %s2605_s0 = inlined_call_operand.vmem [shape: bf16[56,28], index: 0, kind: input, shape index: {}]   ;;  %s2606_s1 = inlined_call_operand.hbm [shape: bf16[84,26], index: 1, kind: input, shape index: {}]   ;;  %s2607_s2 = inlined_call_operand.hbm [shape: bf16[26,13], index: 2, kind: input, shape index: {}]   ;;  %s2608_s3 = inlined_call_operand.hbm [shape: bf16[39,104], index: 3, kind: input, shape index: {}]   ;;  %s2609_s4 = inlined_call_operand.vmem [shape: f32[104,8], index: 4, kind: input, shape index: {}]   ;;  %s2610_s5 = inlined_call_operand.vmem [shape: f32[8,624], index: 5, kind: input, shape index: {}]   ;;  %s2611_s6 = inlined_call_operand.hbm [shape: f32[624,64], index: 6, kind: input, shape index: {}]   ;;  %s2612_s7 = inlined_call_operand.vmem [shape: f32[64,128], index: 7, kind: input, shape index: {}]   ;;  %s2613_s8 = inlined_call_operand.vmem [shape: f32[8,12], index: 8, kind: input, shape index: {}]   ;;  %s2614_s9 = inlined_call_operand.vmem [shape: f32[8,128], index: 9, kind: input, shape index: {}]   ;;  %s2615_s10 = inlined_call_operand.hbm [shape: f32[2,128], index: 10, kind: output, shape index: {}]  }
   0x1   :  { %16 = vsyncpa [#allocation6], 0 }
   0x2   :  { %17 = vsyncpa [#allocation9], 0 }
   0x3   :  { %18 = vsyncpa [#allocation4], 0  ;;  %s2215_s13 = smov [#allocation5]   ;;  %s2216_s15 = smov [#allocation2]  }
   0x4   :  { %s38_s14 = sshll.u32 %s2215_s13, 4  ;;  %s26_s16 = sshll.u32 %s2216_s15, 4  ;;  %s39_s14 = int_to_ptr.vmem [resolvable:$true] %s38_s14  ;;  %s2292_s16 = int_to_ptr.vmem [resolvable:$true] %s26_s16 }
   0x5   :  { %s2097_s19 = scalar_lea.hbm %s2607_s2, 256 }
   0x6   :  { %p2098_p0 = scmp.ne.s32.totalorder %s2607_s2, %s2097_s19  ;;  %p2101_p1 = scmp.lt.u32.totalorder %s2097_s19, %s2607_s2 }
   0x8   :  { %p2103_p2 = pnand %p2101_p1, %p2098_p0 }
   0xa   :  { %2106 = shalt.err (!%p2103_p2)
}
   0xb   :  { %s2107_s24 = scalar_lea.vmem %s39_s14, 256  ;;  %p2112_p4 = scmp.lt.s32.totalorder %s39_s14, %s39_s14 }
   0xc   :  { %p2108_p3 = scmp.ne.s32.totalorder %s39_s14, %s2107_s24  ;;  %p2113_p5 = scmp.lt.s32.totalorder %s2107_s24, %s2107_s24 }
   0xe   :  { %p2114_p6 = por %p2113_p5, %p2112_p4 }
  0x10   :  { %p2115_p7 = pnand %p2114_p6, %p2108_p3 }
  0x12   :  { %2118 = shalt.err (!%p2115_p7)
}
  0x13   :  { %s2217_s25 = smov 64   ;;  %s2218_s26 = smov 4  }
  0x14   :  { %44 = dma.hbm_to_vmem [thread:$0]  %s2607_s2, 256, %s39_s14, [#allocation6], %s2217_s25, %s2217_s25, %s2218_s26  }
  0x15   :  { %s2119_s11 = scalar_lea.hbm %s2606_s1, 704 }
  0x16   :  { %p2120_p8 = scmp.ne.s32.totalorder %s2606_s1, %s2119_s11  ;;  %p2123_p9 = scmp.lt.u32.totalorder %s2119_s11, %s2606_s1 }
  0x18   :  { %p2125_p10 = pnand %p2123_p9, %p2120_p8 }
  0x1a   :  { %2128 = shalt.err (!%p2125_p10)
}
  0x1b   :  { %s2129_s18 = scalar_lea.vmem %s2292_s16, 704  ;;  %p2134_p12 = scmp.lt.s32.totalorder %s2292_s16, %s2292_s16 }
  0x1c   :  { %p2130_p11 = scmp.ne.s32.totalorder %s2292_s16, %s2129_s18  ;;  %p2135_p13 = scmp.lt.s32.totalorder %s2129_s18, %s2129_s18 }
  0x1e   :  { %p2136_p0 = por %p2135_p13, %p2134_p12 }
  0x20   :  { %p2137_p1 = pnand %p2136_p0, %p2130_p11 }
  0x22   :  { %2140 = shalt.err (!%p2137_p1)
}
  0x23   :  { %32 = dma.hbm_to_vmem [thread:$0]  %s2606_s1, 704, %s2292_s16, [#allocation3], %s2217_s25, %s2217_s25, %s2218_s26  }
  0x24   :  { %s2219_s19 = smov [#allocation7]   ;;  %s2220_s21 = smov [#allocation8]  }
  0x25   :  { %s50_s20 = sshll.u32 %s2219_s19, 4  ;;  %s66_s22 = sshll.u32 %s2220_s21, 4  ;;  %s51_s20 = int_to_ptr.vmem [resolvable:$true] %s50_s20  ;;  %s2329_s22 = int_to_ptr.vmem [resolvable:$true] %s66_s22 }
  0x26   :  { %s2141_s27 = scalar_lea.hbm %s2608_s3, 320 }
  0x27   :  { %p2142_p2 = scmp.ne.s32.totalorder %s2608_s3, %s2141_s27  ;;  %p2145_p3 = scmp.lt.u32.totalorder %s2141_s27, %s2608_s3 }
  0x29   :  { %p2147_p4 = pnand %p2145_p3, %p2142_p2 }
  0x2b   :  { %2150 = shalt.err (!%p2147_p4)
}
  0x2c   :  { %s2151_s1 = scalar_lea.vmem %s51_s20, 320  ;;  %p2156_p6 = scmp.lt.s32.totalorder %s51_s20, %s51_s20 }
  0x2d   :  { %p2152_p5 = scmp.ne.s32.totalorder %s51_s20, %s2151_s1  ;;  %p2157_p7 = scmp.lt.s32.totalorder %s2151_s1, %s2151_s1 }
  0x2f   :  { %p2158_p8 = por %p2157_p7, %p2156_p6 }
  0x31   :  { %p2159_p9 = pnand %p2158_p8, %p2152_p5 }
  0x33   :  { %2162 = shalt.err (!%p2159_p9)
}
  0x34   :  { %56 = dma.hbm_to_vmem [thread:$0]  %s2608_s3, 320, %s51_s20, [#allocation6], %s2217_s25, %s2217_s25, %s2218_s26  }
  0x35   :  { %s2163_s17 = scalar_lea.hbm %s2611_s6, 9984 }
  0x36   :  { %p2164_p10 = scmp.ne.s32.totalorder %s2611_s6, %s2163_s17  ;;  %p2167_p11 = scmp.lt.u32.totalorder %s2163_s17, %s2611_s6 }
  0x38   :  { %p2169_p12 = pnand %p2167_p11, %p2164_p10 }
  0x3a   :  { %2172 = shalt.err (!%p2169_p12)
}
  0x3b   :  { %s2173_s21 = scalar_lea.vmem %s2329_s22, 9984  ;;  %p2178_p0 = scmp.lt.s32.totalorder %s2329_s22, %s2329_s22 }
  0x3c   :  { %p2174_p13 = scmp.ne.s32.totalorder %s2329_s22, %s2173_s21  ;;  %p2179_p1 = scmp.lt.s32.totalorder %s2173_s21, %s2173_s21 }
  0x3e   :  { %p2180_p2 = por %p2179_p1, %p2178_p0 }
  0x40   :  { %p2181_p3 = pnand %p2180_p2, %p2174_p13 }
  0x42   :  { %2184 = shalt.err (!%p2181_p3)
}
  0x43   :  { %s2221_s3 = smov 128   ;;  %s2222_s25 = smov 8  }
  0x44   :  { %72 = dma.hbm_to_vmem [thread:$0]  %s2611_s6, 9984, %s2329_s22, [#allocation9], %s2221_s3, %s2221_s3, %s2222_s25  }
  0x45   :  { %2207 = dma.done.wait [#allocation3], 704  }
  0x46   :  { %2208 = vsyncadd [#allocation3], 4294966592 }
  0x47   :  { %2209 = dma.done.wait [#allocation6], 576  }
  0x48   :  { %2210 = vsyncadd [#allocation6], 4294966720 }
  0x49   :  { %2211 = dma.done.wait [#allocation9], 9984  }
  0x4a   :  { %2212 = vsyncadd [#allocation9], 4294957312  ;;  %vm129_vm0 = vcmask 1045504   ;;  %v2082_v0 = vld [vmem:[%s2605_s0] sm:$0xff]   ;;  %v2370_v1 = vld [vmem:[%s2605_s0 + $0x8] sm:$0xff]   ;;  %vm117_vm1 = vcmask 1046528  }
  0x4b   :  { %v2375_v2 = vld [vmem:[%s2605_s0 + $0x10] sm:$0xff]   ;;  %v130_v3 = vrot.slane %v2082_v0, 2  ;;  %v131_v4 = vrot.slane %v2370_v1, 2  ;;  %v118_v5 = vrot.slane %v2082_v0, 1  ;;  %v119_v6 = vrot.slane %v2370_v1, 1  ;;  %v2086_v12 = vld [vmem:[#allocation2] sm:$0xff]  }
  0x4c   :  { %v133_v7 = vrot.slane %v2375_v2, 2  ;;  %v121_v8 = vrot.slane %v2375_v2, 1  ;;  %v2085_v9 = vld [vmem:[%s2605_s0 + $0x18] ss:$0 sps:$4 sm:$0xff]   ;;  %s2223_s11 = smov 56   ;;  %s2224_s1 = smov 28   ;;  %1782 = vmatprep.subr.bf16.mxu0 %v2086_v12 }
  0x4d   :  { %v132_v10 = vsel %vm129_vm0, %v130_v3, %v131_v4  ;;  %v120_v11 = vsel %vm117_vm1, %v118_v5, %v119_v6  ;;  %v123_v13 = vrot.slane %v2085_v9, 1  ;;  %vm125_vm2 = vcmask 1042432   ;;  %v2087_v14 = vld [vmem:[#allocation2 + $0x8] sm:$0xff]   ;;  %1783 = vmatpush3.bf16.msra.mxu0 %v2086_v12  ;;  %v2088_v18 = vld [vmem:[#allocation2 + $0x10] sm:$0xff]   ;;  %v2089_v22 = vld [vmem:[#allocation2 + $0x18] sm:$0xff]   ;;  %s2227_s15 = smov 13  }
  0x4e   :  { %151 = vrot.lane.b32.xlu1 %v132_v10, %s2223_s11  ;;  %142 = vrot.lane.b32.xlu0 %v120_v11, %s2224_s1  ;;  %v134_v15 = vsel %vm129_vm0, %v131_v4, %v133_v7  ;;  %v122_v16 = vsel %vm117_vm1, %v119_v6, %v121_v8  ;;  %v135_v17 = vrot.slane %v2085_v9, 2  ;;  %vm137_vm3 = vcmask 1041408   ;;  %v2090_v25 = vld [vmem:[#allocation2 + $0x20] sm:$0xff]   ;;  %v2091_v26 = vld [vmem:[#allocation2 + $0x28] ss:$0 sps:$4 sm:$0x33]  }
  0x4f   :  { %1784 = vmatprep.subr.bf16.mxu0 %v2087_v14  ;;  %v128_v19 = vsel %vm125_vm2, %v123_v13, 0  ;;  %v124_v20 = vsel %vm117_vm1, %v121_v8, %v123_v13  ;;  %v235_v27 = vsel %vm137_vm3, %v2091_v26, 0  ;;  %vm159_vm4 = vcmask 228352   ;;  %v2092_v44 = vld [vmem:[#allocation5] sm:$0xff]   ;;  %v2093_v45 = vld [vmem:[#allocation5 + $0x8] sm:$0x1f]  }
  0x50   :  { %v139_v21 = vsel %vm137_vm3, %v135_v17, 0  ;;  %v136_v24 = vsel %vm129_vm0, %v133_v7, %v135_v17  ;;  %vm172_vm5 = vcmask 457728   ;;  %vm225_vm6 = vcmask 687104   ;;  %1802 = vmatprep.subr.bf16.mxu1 %v2092_v44  ;;  %s2228_s17 = smov 26   ;;  %s2229_s2 = smov 124  }
  0x51   :  { %1785 = vmatpush3.bf16.msra.mxu0 %v2087_v14  ;;  %v140_v23 = vsel %vm125_vm2, %v139_v21, 0  ;;  %1803 = vmatpush3.bf16.msra.mxu1 %v2092_v44  ;;  %vm395_vm7 = vcmask 1044480   ;;  %vm361_vm8 = vcmask 1043456   ;;  %vm388_vm9 = vcmask 211968   ;;  %s2232_s21 = smov 32   ;;  %s2234_s3 = smov 127  }
  0x52   :  { %153 = vrot.lane.b32.xlu1 %v134_v15, %s2223_s11  ;;  %144 = vrot.lane.b32.xlu0 %v122_v16, %s2224_s1  ;;  %v397_v46 = vsel %vm395_vm7, %v2093_v45, 0  ;;  %vm494_vm10 = vcmask 105472   ;;  %vm530_vm11 = vcmask 318464   ;;  %vm608_vm12 = vcmask 850944   ;;  %s2236_s24 = smov [#allocation10]  }
  0x53   :  { %1786 = vmatprep.subr.bf16.mxu0 %v2088_v18  ;;  %2039 = vmatprep.subr.msk.bf16.mxu1 %vm395_vm7, %v2093_v45  ;;  %vm2233_vm13 = vmmov 0   ;;  %vm940_vm14 = vcmask 654336   ;;  %vm943_vm15 = vcmask 261120   ;;  %vm829_vm1 = vcmask 31744   ;;  %s1595_s27 = sshll.u32 %s2236_s24, 4  ;;  %s1596_s27 = int_to_ptr.vmem [resolvable:$true] %s1595_s27 }
  0x54   :  { %s2185_s28 = scalar_lea.vmem %s1596_s27, 32  ;;  %p2190_p5 = scmp.lt.s32.totalorder %s1596_s27, %s1596_s27 }
  0x55   :  { %1787 = vmatpush3.bf16.msra.mxu0 %v2088_v18  ;;  %1805 = vmatpush3.bf16.msra.mxu1 %v397_v46  ;;  %p2186_p4 = scmp.ne.s32.totalorder %s1596_s27, %s2185_s28  ;;  %p2191_p6 = scmp.lt.s32.totalorder %s2185_s28, %s2185_s28 }
  0x56   :  { %148 = vrot.lane.b32.xlu1 %v128_v19, %s2224_s1  ;;  %146 = vrot.lane.b32.xlu0 %v124_v20, %s2224_s1 }
  0x57   :  { %1788 = vmatprep.subr.bf16.mxu0 %v2089_v22  ;;  %p2192_p7 = por %p2191_p6, %p2190_p5 }
  0x59   :  { %1789 = vmatpush3.bf16.msra.mxu0 %v2089_v22  ;;  %p2193_p8 = pnand %p2192_p7, %p2186_p4 }
  0x5a   :  { %157 = vrot.lane.b32.xlu1 %v140_v23, %s2223_s11  ;;  %155 = vrot.lane.b32.xlu0 %v136_v24, %s2223_s11 }
  0x5b   :  { %1790 = vmatprep.subr.bf16.mxu0 %v2090_v25 }
  0x5d   :  { %1791 = vmatpush3.bf16.msra.mxu0 %v2090_v25 }
  0x5e   :  { %2038 = vmatprep.subr.msk.bf16.mxu0 %vm137_vm3, %v2091_v26 }
  0x61   :  { %1793 = vmatpush3.bf16.msra.mxu0 %v235_v27 }
  0xc0   :  { %v152_v28 = vpop.permute.xlu1 %151  ;;  %v143_v29 = vpop.permute.xlu0 %142 }
  0xc1   :  { %v162_v30 = vsel %vm159_vm4, %v2082_v0, %v143_v29 }
  0xc2   :  { %v174_v31 = vsel %vm172_vm5, %v162_v30, %v152_v28 }
  0xc3   :  { %1794 = vmatprep.mubr.msk.bf16.mxu0 %vm225_vm6, %v174_v31 }
  0xc4   :  { %v154_v32 = vpop.permute.xlu1 %153  ;;  %v145_v33 = vpop.permute.xlu0 %144 }
  0xc5   :  { %v165_v34 = vsel %vm159_vm4, %v2370_v1, %v145_v33 }
  0xc6   :  { %v176_v35 = vsel %vm172_vm5, %v165_v34, %v154_v32 }
  0xc7   :  { %1795 = vmatmul.mubr.msk.bf16.vlgmr.msra.gmra.mrb[0].mxu0 %vm225_vm6, %v176_v35 }
  0xc8   :  { %v149_v36 = vpop.permute.xlu1 %148  ;;  %v147_v37 = vpop.permute.xlu0 %146 }
  0xc9   :  { %v171_v38 = vsel %vm159_vm4, %v2085_v9, %v149_v36  ;;  %v168_v39 = vsel %vm159_vm4, %v2375_v2, %v147_v37  ;;  %vm1286_vm4 = vcmask 916480  }
  0xcc   :  { %v158_v40 = vpop.permute.xlu1 %157  ;;  %v156_v41 = vpop.permute.xlu0 %155 }
  0xcd   :  { %v180_v42 = vsel %vm172_vm5, %v171_v38, %v158_v40  ;;  %v178_v43 = vsel %vm172_vm5, %v168_v39, %v156_v41  ;;  %v2225_v39 = vmov 0.0   ;;  %v2094_v40 = vld [vmem:[#allocation7] sm:$0xff]   ;;  %v2095_v41 = vld [vmem:[#allocation7 + $0x8] sm:$0xff]  }
  0xce   :  { %1798 = vmatprep.mubr.msk.bf16.mxu0 %vm225_vm6, %v178_v43  ;;  %1857 = vmatprep.subr.mxu0 %v2225_v39  ;;  %v2226_v43 = vmov 65535  }
  0xcf   :  { %1799 = vmatmul.mubr.msk.bf16.gmra.mrb[4].mxu0 %vm225_vm6, %v180_v42  ;;  %1810 = vmatprep.subr.bf16.mxu1 %v2094_v40  ;;  %v2096_v42 = vld [vmem:[#allocation7 + $0x10] ss:$0 sps:$4 sm:$0xff]   ;;  %v537_v44 = vsel %vm125_vm2, 4294967295, %v2226_v43  ;;  %v606_v43 = vld [vmem:[%s2609_s4 + $0x58] sm:$0xff]  ;;  %vm961_vm2 = vcmask 1039360  }
  0xd0   :  { %v538_v45 = vsel %vm361_vm8, %v537_v44, 0  ;;  %1859 = vmatprep.mubr.msk.f32.mxu0 %vm2233_vm13, %v2225_v39 }
  0xd1   :  { %v540_v46 = vand.u32 %v2096_v42, %v538_v45  ;;  %v605_v42 = vld [vmem:[%s2609_s4 + $0x50] sm:$0xff]  ;;  %v607_v45 = vld [vmem:[%s2609_s4 + $0x60] sm:$0xff] }
  0xd2   :  { %v1937_v44 = vpack.c.bf16 %v606_v43, %v605_v42  ;;  %v1634_v43 = vld [vmem:[%s2614_s9 + $0x1] ss:$0 sm:$0xff] }
 0x19a   :  { %v1796_v47 = vpop.f32.mrb[0].mxu0 }
 0x19b   :  { %v280_v48 = vadd.f32 -0.20650767, %v1796_v47  ;;  %v271_v49 = vpop.f32.mrb[1].mxu0 }
 0x19c   :  { %v272_v50 = vadd.f32 -0.20650767, %v271_v49  ;;  %v1797_v51 = vpop.f32.mrb[2].mxu0 }
 0x19d   :  { %v303_v52 = vmax.f32 %v280_v48, 0.0  ;;  %v283_v53 = vadd.f32 -0.20650767, %v1797_v51  ;;  %v274_v54 = vpop.f32.mrb[3].mxu0 }
 0x19e   :  { %v301_v55 = vmax.f32 %v272_v50, 0.0  ;;  %v275_v56 = vadd.f32 -0.20650767, %v274_v54 }
 0x19f   :  { %v317_v57 = vrot.slane %v303_v52, 2  ;;  %v304_v58 = vmax.f32 %v283_v53, 0.0 }
 0x1a0   :  { %v309_v59 = vrot.slane %v301_v55, 2  ;;  %v302_v60 = vmax.f32 %v275_v56, 0.0  ;;  %v595_v56 = vld [vmem:[%s2609_s4] sm:$0xff] }
 0x1a1   :  { %v319_v61 = vadd.f32 %v317_v57, %v303_v52  ;;  %v321_v62 = vrot.slane %v304_v58, 2  ;;  %v596_v57 = vld [vmem:[%s2609_s4 + $0x8] sm:$0xff] }
 0x1a2   :  { %v311_v63 = vadd.f32 %v309_v59, %v301_v55  ;;  %v313_v0 = vrot.slane %v302_v60, 2  ;;  %v1800_v1 = vpop.f32.mrb[4].mxu0 }
 0x1a3   :  { %v345_v2 = vrot.slane %v319_v61, 2  ;;  %v323_v3 = vadd.f32 %v321_v62, %v304_v58  ;;  %v296_v4 = vadd.f32 -0.20650767, %v1800_v1  ;;  %v287_v5 = vpop.f32.mrb[5].mxu0 }
 0x1a4   :  { %v337_v6 = vrot.slane %v311_v63, 2  ;;  %v315_v7 = vadd.f32 %v313_v0, %v302_v60  ;;  %v288_v8 = vadd.f32 -0.20650767, %v287_v5  ;;  %v1801_v9 = vpop.f32.mrb[6].mxu0 }
 0x1a5   :  { %v348_v10 = vrot.slane %v323_v3, 4  ;;  %v350_v11 = vrot.slane %v323_v3, 6  ;;  %v290_v12 = vpop.f32.mrb[7].mxu0  ;;  %v365_v13 = vsel %vm137_vm3, %v319_v61, %v345_v2  ;;  %v307_v18 = vmax.f32 %v296_v4, 0.0 }
 0x1a6   :  { %v340_v14 = vrot.slane %v315_v7, 4  ;;  %v342_v15 = vrot.slane %v315_v7, 6  ;;  %v305_v16 = vmax.f32 %v288_v8, 0.0  ;;  %v291_v17 = vadd.f32 -0.20650767, %v290_v12 }
 0x1a7   :  { %v360_v19 = vsel %vm137_vm3, %v311_v63, %v337_v6  ;;  %v366_v20 = vsel %vm361_vm8, %v365_v13, %v348_v10  ;;  %v333_v29 = vrot.slane %v307_v18, 2  ;;  %v1917_v63 = vpack.c.bf16 %v596_v57, %v595_v56 }
 0x1a8   :  { %v325_v21 = vrot.slane %v305_v16, 2  ;;  %v306_v22 = vmax.f32 %v291_v17, 0.0  ;;  %v362_v23 = vsel %vm361_vm8, %v360_v19, %v340_v14  ;;  %v367_v24 = vsel %vm129_vm0, %v366_v20, %v350_v11 }
 0x1a9   :  { %v364_v25 = vsel %vm129_vm0, %v362_v23, %v342_v15  ;;  %v335_v35 = vadd.f32 %v333_v29, %v307_v18 }
 0x1aa   :  { %v327_v26 = vadd.f32 %v325_v21, %v305_v16  ;;  %v329_v27 = vrot.slane %v306_v22, 2  ;;  %v371_v28 = vpack.c.bf16 %v367_v24, %v364_v25  ;;  %v597_v25 = vld [vmem:[%s2609_s4 + $0x10] sm:$0xff] }
 0x1ac   :  { %v353_v30 = vrot.slane %v327_v26, 2  ;;  %v331_v31 = vadd.f32 %v329_v27, %v306_v22  ;;  %1806 = vmatprep.mubr.msk.bf16.mxu1 %vm388_vm9, %v371_v28 }
 0x1ae   :  { %v368_v32 = vsel %vm137_vm3, %v327_v26, %v353_v30  ;;  %v356_v33 = vrot.slane %v331_v31, 4  ;;  %v358_v34 = vrot.slane %v331_v31, 6  ;;  %v598_v26 = vld [vmem:[%s2609_s4 + $0x18] sm:$0xff] }
 0x1af   :  { %v1921_v31 = vpack.c.bf16 %v598_v26, %v597_v25 }
 0x1b0   :  { %v369_v36 = vsel %vm361_vm8, %v368_v32, %v356_v33  ;;  %v599_v32 = vld [vmem:[%s2609_s4 + $0x20] sm:$0xff]  ;;  %v600_v33 = vld [vmem:[%s2609_s4 + $0x28] sm:$0xff] }
 0x1b1   :  { %v370_v37 = vsel %vm129_vm0, %v369_v36, %v358_v34  ;;  %v1925_v34 = vpack.c.bf16 %v600_v33, %v599_v32  ;;  %v602_v36 = vld [vmem:[%s2609_s4 + $0x38] sm:$0xff] }
 0x1b2   :  { %v372_v38 = vpack.c.bf16 %v335_v35, %v370_v37  ;;  %v601_v35 = vld [vmem:[%s2609_s4 + $0x30] sm:$0xff] }
 0x1b3   :  { %v1929_v37 = vpack.c.bf16 %v602_v36, %v601_v35 }
 0x1b4   :  { %1807 = vmatmul.mubr.msk.bf16.vlgmr.msra.gmra.mrb[0].mxu1 %vm388_vm9, %v372_v38  ;;  %v603_v38 = vld [vmem:[%s2609_s4 + $0x40] sm:$0xff] }
 0x1b5   :  { %1811 = vmatpush3.bf16.msra.mxu1 %v2094_v40  ;;  %v604_v40 = vld [vmem:[%s2609_s4 + $0x48] sm:$0xff]  ;;  %s2230_s4 = smov 80  }
 0x1b6   :  { %1812 = vmatprep.subr.bf16.mxu1 %v2095_v41 }
 0x1b9   :  { %1813 = vmatpush3.bf16.msra.mxu1 %v2095_v41  ;;  %v1933_v41 = vpack.c.bf16 %v604_v40, %v603_v38 }
 0x1ba   :  { %1814 = vmatprep.subr.bf16.mxu1 %v540_v46 }
 0x1bd   :  { %1815 = vmatpush3.bf16.msra.mxu1 %v540_v46  ;;  %v740_v46 = vld [vmem:[%s2613_s8] sm:$0xff]  ;;  %s2231_s8 = smov 104  }
 0x1be   :  { %1918 = vmatprep.subr.bf16.mxu1 %v1917_v63 }
 0x287   :  { %v1808_v47 = vpop.f32.mrb[0].mxu1 }
 0x288   :  { %v433_v48 = vpop.f32.mrb[1].mxu1  ;;  %v454_v49 = vrot.slane %v1808_v47, 6  ;;  %v465_v51 = vrot.slane %v1808_v47, 2 }
 0x289   :  { %v1809_v50 = vpop.f32.mrb[2].mxu1  ;;  %v451_v52 = vrot.slane %v433_v48, 6  ;;  %v462_v58 = vrot.slane %v433_v48, 2 }
 0x28a   :  { %v2062_v53 = vpack.i.bf16 %v1809_v50, %v1808_v47  ;;  %v467_v54 = vrot.slane %v1809_v50, 2  ;;  %v436_v55 = vpop.f32.mrb[3].mxu1 }
 0x28b   :  { %v2067_v59 = vpack.i.bf16 %v436_v55, %v433_v48  ;;  %v452_v60 = vrot.slane %v436_v55, 6  ;;  %v463_v61 = vrot.slane %v436_v55, 2  ;;  %v460_v13 = vsel %vm137_vm3, 0.0, %v451_v52  ;;  %v1624_v48 = vld [vmem:[%s2614_s9] ss:$0 sm:$0xff] }
 0x28c   :  { %2063 = vrot.lane.b32.xlu1 %v2062_v53, %s2227_s15  ;;  %v468_v62 = vsel %vm129_vm0, %v465_v51, %v467_v54 }
 0x28d   :  { %v453_v0 = vsel %vm137_vm3, %v451_v52, %v452_v60  ;;  %v455_v1 = vsel %vm137_vm3, %v452_v60, %v454_v49  ;;  %2068 = vrot.lane.b32.xlu0 %v2067_v59, %s2227_s15  ;;  %v2077_v2 = vpack.i.bf16 %v2225_v39, %v468_v62  ;;  %v464_v3 = vsel %vm129_vm0, %v462_v58, %v463_v61 }
 0x28e   :  { %v466_v4 = vsel %vm129_vm0, %v463_v61, %v465_v51  ;;  %vm746_vm0 = vcmask 64512   ;;  %vm971_vm3 = vcmask 908288  }
 0x28f   :  { %v2072_v5 = vpack.i.bf16 %v466_v4, %v464_v3 }
 0x290   :  { %2078 = vrot.lane.b32.xlu1 %v2077_v2, %s2228_s17 }
 0x291   :  { %2073 = vrot.lane.b32.xlu0 %v2072_v5, %s2228_s17 }
 0x295   :  { %827 = vrot.lane.b32.xlu0 %v740_v46, %s2229_s2 }
 0x2fe   :  { %v2064_v6 = vpop.permute.xlu1 %2063 }
 0x2ff   :  { %v2069_v7 = vpop.permute.xlu0 %2068  ;;  %v2066_v8 = vunpack.i.h.bf16 %v2064_v6  ;;  %v2065_v9 = vunpack.i.l.bf16 %v2064_v6 }
 0x300   :  { %v2071_v10 = vunpack.i.h.bf16 %v2069_v7  ;;  %v2070_v11 = vunpack.i.l.bf16 %v2069_v7 }
 0x301   :  { %v498_v17 = vsel %vm494_vm10, %v454_v49, %v2066_v8  ;;  %v497_v18 = vsel %vm494_vm10, %v455_v1, %v2065_v9 }
 0x302   :  { %v2079_v12 = vpop.permute.xlu1 %2078  ;;  %v495_v21 = vsel %vm494_vm10, %v460_v13, %v2070_v11  ;;  %v496_v22 = vsel %vm494_vm10, %v453_v0, %v2071_v10 }
 0x303   :  { %v2081_v14 = vunpack.i.h.bf16 %v2079_v12  ;;  %v2080_v15 = vunpack.i.l.bf16 %v2079_v12  ;;  %v2074_v16 = vpop.permute.xlu0 %2073 }
 0x304   :  { %v2076_v19 = vunpack.i.h.bf16 %v2074_v16  ;;  %v2075_v20 = vunpack.i.l.bf16 %v2074_v16 }
 0x305   :  { %v502_v23 = vsel %vm388_vm9, %v498_v17, %v2081_v14  ;;  %v501_v24 = vsel %vm388_vm9, %v497_v18, %v2080_v15 }
 0x306   :  { %v504_v27 = vpack.c.bf16 %v502_v23, %v501_v24  ;;  %v499_v28 = vsel %vm388_vm9, %v495_v21, %v2075_v20  ;;  %v500_v29 = vsel %vm388_vm9, %v496_v22, %v2076_v19 }
 0x307   :  { %v503_v30 = vpack.c.bf16 %v500_v29, %v499_v28  ;;  %v828_v47 = vpop.permute.xlu0 %827 }
 0x308   :  { %1858 = vmatpush3.msk.msra.mxu0 %vm361_vm8, %v828_v47 }
 0x309   :  { %1816 = vmatprep.mubr.msk.bf16.mxu1 %vm530_vm11, %v503_v30 }
 0x30a   :  { %1817 = vmatmul.mubr.msk.bf16.vlgmr.msra.gmra.mrb[4].mxu1 %vm530_vm11, %v504_v27 }
 0x30b   :  { %1920 = vmatpush3.bf16.msra.mxu1 %v1917_v63 }
 0x30c   :  { %1922 = vmatprep.subr.bf16.mxu1 %v1921_v31 }
 0x30f   :  { %1924 = vmatpush3.bf16.msra.mxu1 %v1921_v31 }
 0x310   :  { %1926 = vmatprep.subr.bf16.mxu1 %v1925_v34 }
 0x313   :  { %1928 = vmatpush3.bf16.msra.mxu1 %v1925_v34 }
 0x314   :  { %1930 = vmatprep.subr.bf16.mxu1 %v1929_v37 }
 0x317   :  { %1932 = vmatpush3.bf16.msra.mxu1 %v1929_v37 }
 0x318   :  { %1934 = vmatprep.subr.bf16.mxu1 %v1933_v41 }
 0x31b   :  { %1936 = vmatpush3.bf16.msra.mxu1 %v1933_v41 }
 0x31c   :  { %1938 = vmatprep.subr.bf16.mxu1 %v1937_v44 }
 0x31f   :  { %1940 = vmatpush3.bf16.msra.mxu1 %v1937_v44 }
 0x320   :  { %1844 = vmatprep.subr.mxu1 %v607_v45 }
 0x323   :  { %1845 = vmatpush3.msra.mxu1 %v607_v45 }
 0x324   :  { %1852 = vmatprep.subr.mxu1 %v2225_v39 }
 0x3dd   :  { %v1818_v49 = vpop.f32.mrb[4].mxu1 }
 0x3de   :  { %v576_v50 = vpop.f32.mrb[5].mxu1  ;;  %v585_v51 = vadd.f32 %v1818_v49, %v1624_v48  ;;  %v978_v49 = vld [vmem:[%s2610_s5] sm:$0xff] }
 0x3df   :  { %v577_v52 = vadd.f32 %v1624_v48, %v576_v50  ;;  %v1819_v53 = vpop.f32.mrb[6].mxu1  ;;  %v982_v50 = vld [vmem:[%s2610_s5 + $0x20] sm:$0xff] }
 0x3e0   :  { %v579_v54 = vpop.f32.mrb[7].mxu1  ;;  %v593_v57 = vmax.f32 %v585_v51, 0.0  ;;  %v588_v60 = vadd.f32 %v1819_v53, %v1624_v48  ;;  %v981_v51 = vld [vmem:[%s2610_s5 + $0x18] sm:$0xff]  ;;  %v1252_v53 = vld [vmem:[#allocation8 + $0x188] sm:$0xff] }
 0x3e1   :  { %v591_v55 = vmax.f32 %v577_v52, 0.0  ;;  %v580_v56 = vadd.f32 %v1624_v48, %v579_v54  ;;  %v979_v48 = vld [vmem:[%s2610_s5 + $0x8] sm:$0xff]  ;;  %v1251_v52 = vld [vmem:[#allocation8 + $0x180] sm:$0xff] }
 0x3e2   :  { %v915_v63 = vrot.slane %v593_v57, 2  ;;  %v594_v2 = vmax.f32 %v588_v60, 0.0  ;;  %986 = vmatprep.subr.mxu0 %v979_v48  ;;  %v1973_v54 = vpack.c.bf16 %v1252_v53, %v1251_v52  ;;  %v1228_v53 = vld [vmem:[#allocation8 + $0xc8] sm:$0xff] }
 0x3e3   :  { %v909_v58 = vrot.slane %v591_v55, 2  ;;  %v592_v59 = vmax.f32 %v580_v56, 0.0  ;;  %1846 = vmatprep.mubr.msk.f32.mxu1 %vm608_vm12, %v591_v55 }
 0x3e4   :  { %v917_v3 = vmax.f32 %v593_v57, %v915_v63  ;;  %v1235_v63 = vld [vmem:[#allocation8 + $0x100] sm:$0xff] }
 0x3e5   :  { %v911_v61 = vmax.f32 %v591_v55, %v909_v58  ;;  %v912_v62 = vrot.slane %v592_v59, 2  ;;  %1847 = vmatmul.mubr.msk.f32.vlgmr.msra.gmra.mrb[8].mxu1 %vm608_vm12, %v592_v59  ;;  %v1636_v55 = vld [vmem:[%s2614_s9 + $0x2] ss:$0 sm:$0xff] }
 0x3e6   :  { %1849 = vmatprep.mubr.msk.f32.mxu1 %vm608_vm12, %v593_v57  ;;  %1853 = vmatpush3.msra.mxu1 %v740_v46  ;;  %v935_v5 = vrot.slane %v917_v3, 4 }
 0x3e7   :  { %v914_v0 = vmax.f32 %v592_v59, %v912_v62  ;;  %v919_v1 = vrot.slane %v911_v61, 4  ;;  %1862 = vmatprep.subr.mxu1 %v2225_v39  ;;  %v1220_v62 = vld [vmem:[#allocation8 + $0x88] sm:$0xff] }
 0x3e9   :  { %924 = vrot.lane.b32.xlu0 %v914_v0, %s2230_s4  ;;  %920 = vrot.lane.b32.xlu1 %v919_v1, %s2231_s8  ;;  %v927_v4 = vrot.slane %v914_v0, 4  ;;  %v1236_v0 = vld [vmem:[#allocation8 + $0x108] sm:$0xff] }
 0x3ea   :  { %1850 = vmatmul.mubr.msk.f32.gmra.mrb[10].mxu1 %vm608_vm12, %v594_v2  ;;  %v1253_v2 = vld [vmem:[#allocation8 + $0x190] sm:$0xff] }
 0x3eb   :  { %1854 = vmatprep.mubr.msk.f32.mxu1 %vm2233_vm13, %v2225_v39 }
 0x3ed   :  { %932 = vrot.lane.b32.xlu0 %v917_v3, %s2232_s21  ;;  %928 = vrot.lane.b32.xlu1 %v927_v4, %s2223_s11  ;;  %v1254_v3 = vld [vmem:[#allocation8 + $0x198] sm:$0xff] }
 0x3ee   :  { %v980_v4 = vld [vmem:[%s2610_s5 + $0x10] sm:$0xff] }
 0x3f1   :  { %936 = vrot.lane.b32.xlu1 %v935_v5, %s2222_s25 }
 0x45b   :  { %v925_v6 = vpop.permute.xlu0 %924  ;;  %v921_v7 = vpop.permute.xlu1 %920 }
 0x45c   :  { %v2496_v8 = vsel %vm940_vm14, %v921_v7, %v925_v6  ;;  %v2500_v10 = vsel %vm608_vm12, %v911_v61, %v921_v7  ;;  %v1219_v61 = vld [vmem:[#allocation8 + $0x80] sm:$0xff] }
 0x45d   :  { %953 = vrot.lane.b32.xlu0 %v2496_v8, %s2234_s3  ;;  %v1203_v7 = vld [vmem:[#allocation8] sm:$0xff] }
 0x45f   :  { %v929_v9 = vpop.permute.xlu1 %928  ;;  %v933_v12 = vpop.permute.xlu0 %932 }
 0x460   :  { %v2503_v11 = vsel %vm172_vm5, %v925_v6, %v929_v9  ;;  %v2507_v14 = vsel %vm943_vm15, %v929_v9, %v933_v12  ;;  %v1941_v6 = vpack.c.bf16 %v1220_v62, %v1219_v61  ;;  %v1204_v9 = vld [vmem:[#allocation8 + $0x8] sm:$0xff]  ;;  %v1211_v61 = vld [vmem:[#allocation8 + $0x40] sm:$0xff]  ;;  %vm1514_vm5 = vcmask 523264  }
 0x461   :  { %951 = vrot.lane.b32.xlu0 %v2500_v10, %s2234_s3  ;;  %955 = vrot.lane.b32.xlu1 %v2503_v11, %s2234_s3  ;;  %v1212_v62 = vld [vmem:[#allocation8 + $0x48] sm:$0xff] }
 0x463   :  { %v937_v13 = vpop.permute.xlu1 %936 }
 0x464   :  { %v2510_v15 = vsel %vm746_vm0, %v933_v12, %v937_v13  ;;  %v1221_v12 = vld [vmem:[#allocation8 + $0x90] sm:$0xff]  ;;  %v1975_v13 = vpack.c.bf16 %v1236_v0, %v1235_v63 }
 0x465   :  { %957 = vrot.lane.b32.xlu1 %v2507_v14, %s2234_s3  ;;  %959 = vrot.lane.b32.xlu0 %v2510_v15, %s2234_s3  ;;  %v1229_v63 = vld [vmem:[#allocation8 + $0xd0] sm:$0xff] }
 0x4b8   :  { %v1848_v16 = vpop.f32.mrb[8].mxu1 }
 0x4b9   :  { %v687_v17 = vpop.f32.mrb[9].mxu1  ;;  %v718_v26 = vrot.slane %v1848_v16, 2  ;;  %v721_v28 = vrot.slane %v1848_v16, 4  ;;  %v724_v30 = vrot.slane %v1848_v16, 6 }
 0x4ba   :  { %v707_v18 = vrot.slane %v687_v17, 2  ;;  %v710_v20 = vrot.slane %v687_v17, 4  ;;  %v713_v23 = vrot.slane %v687_v17, 6 }
 0x4bc   :  { %v709_v19 = vadd.f32 %v707_v18, %v687_v17  ;;  %v1977_v17 = vpack.c.bf16 %v1254_v3, %v1253_v2  ;;  %v1237_v18 = vld [vmem:[#allocation8 + $0x110] sm:$0xff] }
 0x4bd   :  { %v1851_v21 = vpop.f32.mrb[10].mxu1  ;;  %v1245_v3 = vld [vmem:[#allocation8 + $0x150] sm:$0xff] }
 0x4be   :  { %v712_v22 = vadd.f32 %v710_v20, %v709_v19  ;;  %v697_v24 = vpop.f32.mrb[11].mxu1  ;;  %v1238_v19 = vld [vmem:[#allocation8 + $0x118] sm:$0xff]  ;;  %v1255_v20 = vld [vmem:[#allocation8 + $0x1a0] sm:$0xff] }
 0x4bf   :  { %v729_v34 = vrot.slane %v697_v24, 2  ;;  %v732_v36 = vrot.slane %v697_v24, 4  ;;  %v735_v38 = vrot.slane %v697_v24, 6 }
 0x4c0   :  { %v715_v25 = vadd.f32 %v713_v23, %v712_v22  ;;  %v1943_v22 = vpack.c.bf16 %v1204_v9, %v1203_v7  ;;  %v1213_v7 = vld [vmem:[#allocation8 + $0x50] sm:$0xff]  ;;  %v1214_v9 = vld [vmem:[#allocation8 + $0x58] sm:$0xff] }
 0x4c2   :  { %v716_v27 = vadd.f32 %v1848_v16, %v715_v25  ;;  %v1222_v16 = vld [vmem:[#allocation8 + $0x98] sm:$0xff] }
 0x4c3   :  { %v1945_v23 = vpack.c.bf16 %v1222_v16, %v1221_v12  ;;  %v1206_v25 = vld [vmem:[#allocation8 + $0x18] sm:$0xff]  ;;  %v1232_v16 = vld [vmem:[#allocation8 + $0xe8] sm:$0xff] }
 0x4c4   :  { %v720_v29 = vadd.f32 %v718_v26, %v716_v27  ;;  %v1223_v26 = vld [vmem:[#allocation8 + $0xa0] sm:$0xff]  ;;  %v1979_v27 = vpack.c.bf16 %v1238_v19, %v1237_v18 }
 0x4c5   :  { %v1215_v19 = vld [vmem:[#allocation8 + $0x60] sm:$0xff] }
 0x4c6   :  { %v723_v31 = vadd.f32 %v721_v28, %v720_v29  ;;  %v1224_v28 = vld [vmem:[#allocation8 + $0xa8] sm:$0xff] }
 0x4c8   :  { %v726_v32 = vadd.f32 %v724_v30, %v723_v31  ;;  %v1239_v30 = vld [vmem:[#allocation8 + $0x120] sm:$0xff]  ;;  %v1240_v31 = vld [vmem:[#allocation8 + $0x128] sm:$0xff] }
 0x4ca   :  { %v727_v33 = vadd.f32 %v726_v32, %v697_v24  ;;  %v1205_v24 = vld [vmem:[#allocation8 + $0x10] sm:$0xff] }
 0x4cb   :  { %v1257_v32 = vld [vmem:[#allocation8 + $0x1b0] sm:$0xff] }
 0x4cc   :  { %v731_v35 = vadd.f32 %v729_v34, %v727_v33  ;;  %v1258_v33 = vld [vmem:[#allocation8 + $0x1b8] sm:$0xff]  ;;  %v1947_v34 = vpack.c.bf16 %v1206_v25, %v1205_v24  ;;  %v1217_v25 = vld [vmem:[#allocation8 + $0x70] sm:$0xff] }
 0x4ce   :  { %v734_v37 = vadd.f32 %v732_v36, %v731_v35  ;;  %v1949_v35 = vpack.c.bf16 %v1224_v28, %v1223_v26  ;;  %v1207_v36 = vld [vmem:[#allocation8 + $0x20] sm:$0xff]  ;;  %v1218_v26 = vld [vmem:[#allocation8 + $0x78] sm:$0xff] }
 0x4cf   :  { %v1971_v28 = vpack.c.bf16 %v1218_v26, %v1217_v25  ;;  %v1501_v25 = vld [vmem:[%s2612_s7] sm:$0xff]  ;;  %v1502_v26 = vld [vmem:[%s2612_s7 + $0x8] sm:$0xff] }
 0x4d0   :  { %v737_v40 = vadd.f32 %v735_v38, %v734_v37  ;;  %v1208_v37 = vld [vmem:[#allocation8 + $0x28] sm:$0xff]  ;;  %v1225_v38 = vld [vmem:[#allocation8 + $0xb0] sm:$0xff] }
 0x4d2   :  { %v738_v41 = vadd.f32 %v1851_v21, %v737_v40  ;;  %v1256_v21 = vld [vmem:[#allocation8 + $0x1a8] sm:$0xff]  ;;  %v1983_v40 = vpack.c.bf16 %v1240_v31, %v1239_v30  ;;  %v1247_v30 = vld [vmem:[#allocation8 + $0x160] sm:$0xff] }
 0x4d3   :  { %v1981_v29 = vpack.c.bf16 %v1256_v21, %v1255_v20  ;;  %v1216_v20 = vld [vmem:[#allocation8 + $0x68] sm:$0xff] }
 0x4d4   :  { %v739_v42 = vmul.f32 0.00591716, %v738_v41  ;;  %v1226_v41 = vld [vmem:[#allocation8 + $0xb8] sm:$0xff]  ;;  %v1967_v21 = vpack.c.bf16 %v1216_v20, %v1215_v19  ;;  %v1248_v31 = vld [vmem:[#allocation8 + $0x168] sm:$0xff] }
 0x4d5   :  { %v1953_v48 = vpack.c.bf16 %v1226_v41, %v1225_v38  ;;  %v1250_v38 = vld [vmem:[#allocation8 + $0x178] sm:$0xff]  ;;  %v1280_v20 = vld [vmem:[#allocation8 + $0x268] sm:$0xff] }
 0x4d6   :  { %1855 = vmatmul.mubr.msk.f32.vlgmr.msra.gmra.mrb[12].mxu1 %vm746_vm0, %v739_v42  ;;  %v1985_v42 = vpack.c.bf16 %v1258_v33, %v1257_v32  ;;  %v1999_v33 = vpack.c.bf16 %v1248_v31, %v1247_v30  ;;  %v1505_v30 = vld [vmem:[%s2612_s7 + $0x20] sm:$0xff]  ;;  %v1506_v31 = vld [vmem:[%s2612_s7 + $0x28] sm:$0xff] }
 0x4d7   :  { %1864 = vmatprep.mubr.msk.f32.mxu1 %vm2233_vm13, %v2225_v39  ;;  %1863 = vmatpush3.msra.mxu1 %v982_v50  ;;  %v1210_v50 = vld [vmem:[#allocation8 + $0x38] sm:$0xff] }
 0x4d8   :  { %1974 = vmatprep.subr.bf16.mxu1 %v1973_v54 }
 0x5a9   :  { %v816_v44 = vpop.f32.mrb[12].mxu1 }
 0x5aa   :  { %v817_v45 = vadd.f32 %v1634_v43, %v816_v44  ;;  %v1856_v46 = vpop.f32.mrb[13].mxu1  ;;  %v1241_v43 = vld [vmem:[#allocation8 + $0x130] sm:$0xff]  ;;  %v1242_v44 = vld [vmem:[#allocation8 + $0x138] sm:$0xff] }
 0x5ab   :  { %v1260_v46 = vld [vmem:[#allocation8 + $0x1c8] sm:$0xff]  ;;  %v1987_v52 = vpack.c.bf16 %v1242_v44, %v1241_v43  ;;  %v956_v44 = vpop.permute.xlu1 %955 }
 0x5ac   :  { %v820_v47 = vmax.f32 %v817_v45, 0.0  ;;  %v1259_v45 = vld [vmem:[#allocation8 + $0x1c0] sm:$0xff] }
 0x5ad   :  { %v1989_v54 = vpack.c.bf16 %v1260_v46, %v1259_v45 }
 0x5ae   :  { %1860 = vmatmul.mubr.msk.f32.vlgmr.msra.gmra.mrb[8].mxu0 %vm829_vm1, %v820_v47  ;;  %v1951_v47 = vpack.c.bf16 %v1208_v37, %v1207_v36  ;;  %v1249_v37 = vld [vmem:[#allocation8 + $0x170] sm:$0xff] }
 0x5af   :  { %1050 = vmatprep.mubr.f32.mxu0 %v2225_v39  ;;  %987 = vmatpush1.msra.mxu0 %v978_v49  ;;  %v1209_v49 = vld [vmem:[#allocation8 + $0x30] sm:$0xff]  ;;  %v2003_v41 = vpack.c.bf16 %v1250_v38, %v1249_v37 }
 0x5b0   :  { %1057 = vmatprep.subr.mxu0 %v981_v51  ;;  %v1227_v51 = vld [vmem:[#allocation8 + $0xc0] sm:$0xff] }
 0x681   :  { %v901_v56 = vpop.f32.mrb[8].mxu0 }
 0x682   :  { %v902_v57 = vadd.f32 %v1636_v55, %v901_v56  ;;  %v1861_v58 = vpop.f32.mrb[9].mxu0  ;;  %v1243_v55 = vld [vmem:[#allocation8 + $0x140] sm:$0xff]  ;;  %v1244_v56 = vld [vmem:[#allocation8 + $0x148] sm:$0xff] }
 0x683   :  { %v1262_v58 = vld [vmem:[#allocation8 + $0x1d8] sm:$0xff]  ;;  %v1991_v0 = vpack.c.bf16 %v1244_v56, %v1243_v55 }
 0x684   :  { %v905_v59 = vmul.f32 0.16666667, %v902_v57  ;;  %v1261_v57 = vld [vmem:[#allocation8 + $0x1d0] sm:$0xff] }
 0x685   :  { %v1993_v2 = vpack.c.bf16 %v1262_v58, %v1261_v57 }
 0x686   :  { %v906_v60 = vadd.f32 0.5, %v905_v59  ;;  %v1955_v59 = vpack.c.bf16 %v1210_v50, %v1209_v49  ;;  %v1267_v49 = vld [vmem:[#allocation8 + $0x200] sm:$0xff]  ;;  %v1268_v50 = vld [vmem:[#allocation8 + $0x208] sm:$0xff] }
 0x688   :  { %v907_v1 = vmax.f32 %v906_v60, 0.0  ;;  %v1957_v60 = vpack.c.bf16 %v1228_v53, %v1227_v51 }
 0x68a   :  { %v908_v5 = vmin.f32 %v907_v1, 1.0  ;;  %v1230_v1 = vld [vmem:[#allocation8 + $0xd8] sm:$0xff] }
 0x68c   :  { %1639 = vmatmul.mubr.msk.f32.vlgmr.msra.gmra.mrb[10].mxu0 %vm746_vm0, %v908_v5  ;;  %1865 = vmatmul.mubr.msk.f32.vlgmr.msra.gmra.mrb[14].mxu1 %vm746_vm0, %v908_v5 }
 0x68d   :  { %1058 = vmatpush1.msra.mxu0 %v980_v4  ;;  %1121 = vmatprep.mubr.f32.mxu0 %v2225_v39  ;;  %v1246_v4 = vld [vmem:[#allocation8 + $0x158] sm:$0xff] }
 0x68e   :  { %1942 = vmatprep.subr.bf16.mxu0 %v1941_v6  ;;  %1976 = vmatpush3.bf16.msra.mxu1 %v1975_v13  ;;  %v1961_v6 = vpack.c.bf16 %v1230_v1, %v1229_v63  ;;  %v1995_v12 = vpack.c.bf16 %v1246_v4, %v1245_v3  ;;  %v1231_v13 = vld [vmem:[#allocation8 + $0xe0] sm:$0xff]  ;;  %v1270_v63 = vld [vmem:[#allocation8 + $0x218] sm:$0xff] }
 0x68f   :  { %1978 = vmatprep.subr.bf16.mxu1 %v1977_v17  ;;  %v1963_v17 = vpack.c.bf16 %v1214_v9, %v1213_v7  ;;  %v1965_v18 = vpack.c.bf16 %v1232_v16, %v1231_v13  ;;  %v1276_v13 = vld [vmem:[#allocation8 + $0x248] sm:$0xff] }
 0x690   :  { %1640 = vmatmul.mubr.msk.f32.vlgmr.msra.gmra.mrb[12].mxu0 %vm746_vm0, %v908_v5  ;;  %v1959_v5 = vpack.c.bf16 %v1212_v62, %v1211_v61  ;;  %v1269_v62 = vld [vmem:[#allocation8 + $0x210] sm:$0xff] }
 0x691   :  { %1944 = vmatpush3.bf16.msra.mxu0 %v1943_v22  ;;  %v1233_v22 = vld [vmem:[#allocation8 + $0xf0] sm:$0xff]  ;;  %v2009_v4 = vpack.c.bf16 %v1270_v63, %v1269_v62 }
 0x692   :  { %1946 = vmatprep.subr.bf16.mxu0 %v1945_v23  ;;  %1980 = vmatpush3.bf16.msra.mxu1 %v1979_v27  ;;  %v1234_v23 = vld [vmem:[#allocation8 + $0xf8] sm:$0xff]  ;;  %v1263_v27 = vld [vmem:[#allocation8 + $0x1e0] sm:$0xff] }
 0x693   :  { %1982 = vmatprep.subr.bf16.mxu1 %v1981_v29  ;;  %v1969_v24 = vpack.c.bf16 %v1234_v23, %v1233_v22  ;;  %v1264_v29 = vld [vmem:[#allocation8 + $0x1e8] sm:$0xff] }
 0x694   :  { %v1997_v32 = vpack.c.bf16 %v1264_v29, %v1263_v27  ;;  %v1503_v27 = vld [vmem:[%s2612_s7 + $0x10] sm:$0xff] }
 0x695   :  { %1948 = vmatpush3.bf16.msra.mxu0 %v1947_v34  ;;  %v1265_v34 = vld [vmem:[#allocation8 + $0x1f0] sm:$0xff] }
 0x696   :  { %1950 = vmatprep.subr.bf16.mxu0 %v1949_v35  ;;  %1984 = vmatpush3.bf16.msra.mxu1 %v1983_v40  ;;  %v1266_v35 = vld [vmem:[#allocation8 + $0x1f8] sm:$0xff]  ;;  %v2235_v40 = vmov 0.0|0.0  }
 0x697   :  { %1986 = vmatprep.subr.bf16.mxu1 %v1985_v42  ;;  %v2001_v36 = vpack.c.bf16 %v1266_v35, %v1265_v34  ;;  %v954_v42 = vpop.permute.xlu0 %953  ;;  %v1508_v34 = vld [vmem:[%s2612_s7 + $0x38] sm:$0xff] }
 0x698   :  { %v963_v45 = vsel %vm961_vm2, %v954_v42, %v956_v44 }
 0x699   :  { %1952 = vmatpush3.bf16.msra.mxu0 %v1951_v47  ;;  %v974_v53 = vmax.f32 %v2496_v8, %v963_v45 }
 0x69a   :  { %1954 = vmatprep.subr.bf16.mxu0 %v1953_v48  ;;  %1988 = vmatpush3.bf16.msra.mxu1 %v1987_v52  ;;  %v958_v48 = vpop.permute.xlu1 %957 }
 0x69b   :  { %1990 = vmatprep.subr.bf16.mxu1 %v1989_v54  ;;  %v952_v43 = vpop.permute.xlu0 %951  ;;  %v964_v58 = vsel %vm961_vm2, %v956_v44, %v958_v48 }
 0x69c   :  { %v962_v46 = vsel %vm961_vm2, %v952_v43, %v954_v42 }
 0x69d   :  { %1956 = vmatpush3.bf16.msra.mxu0 %v1955_v59  ;;  %v973_v55 = vmax.f32 %v2500_v10, %v962_v46 }
 0x69e   :  { %1958 = vmatprep.subr.bf16.mxu0 %v1957_v60  ;;  %1992 = vmatpush3.bf16.msra.mxu1 %v1991_v0  ;;  %v2006_v60 = vpack.c.bf16 %v1268_v50, %v1267_v49  ;;  %v1644_v50 = vld [vmem:[%s2614_s9 + $0x4] ss:$0 sm:$0xff] }
 0x69f   :  { %1994 = vmatprep.subr.bf16.mxu1 %v1993_v2  ;;  %v960_v47 = vpop.permute.xlu0 %959  ;;  %v975_v2 = vmax.f32 %v2503_v11, %v964_v58  ;;  %v1273_v11 = vld [vmem:[#allocation8 + $0x230] sm:$0xff] }
 0x6a0   :  { %v965_v54 = vsel %vm961_vm2, %v958_v48, %v960_v47 }
 0x6a1   :  { %1960 = vmatpush3.bf16.msra.mxu0 %v1959_v5  ;;  %v976_v1 = vmax.f32 %v2507_v14, %v965_v54  ;;  %v1271_v5 = vld [vmem:[#allocation8 + $0x220] sm:$0xff]  ;;  %v1274_v14 = vld [vmem:[#allocation8 + $0x238] sm:$0xff] }
 0x6a2   :  { %1962 = vmatprep.subr.bf16.mxu0 %v1961_v6  ;;  %1996 = vmatpush3.bf16.msra.mxu1 %v1995_v12  ;;  %v1272_v6 = vld [vmem:[#allocation8 + $0x228] sm:$0xff]  ;;  %v2015_v9 = vpack.c.bf16 %v1274_v14, %v1273_v11  ;;  %v1275_v12 = vld [vmem:[#allocation8 + $0x240] sm:$0xff] }
 0x6a3   :  { %1998 = vmatprep.subr.bf16.mxu1 %v1997_v32  ;;  %v2012_v7 = vpack.c.bf16 %v1272_v6, %v1271_v5  ;;  %v2018_v16 = vpack.c.bf16 %v1276_v13, %v1275_v12  ;;  %v2033_v32 = vpack.c.bf16 %v1506_v31, %v1505_v30 }
 0x6a5   :  { %1964 = vmatpush3.bf16.msra.mxu0 %v1963_v17  ;;  %v1277_v17 = vld [vmem:[#allocation8 + $0x250] sm:$0xff] }
 0x6a6   :  { %1966 = vmatprep.subr.bf16.mxu0 %v1965_v18  ;;  %2000 = vmatpush3.bf16.msra.mxu1 %v1999_v33  ;;  %v1278_v18 = vld [vmem:[#allocation8 + $0x258] sm:$0xff] }
 0x6a7   :  { %2002 = vmatprep.subr.bf16.mxu1 %v2001_v36  ;;  %v2021_v19 = vpack.c.bf16 %v1278_v18, %v1277_v17  ;;  %v1507_v33 = vld [vmem:[%s2612_s7 + $0x30] sm:$0xff] }
 0x6a8   :  { %v2036_v35 = vpack.c.bf16 %v1508_v34, %v1507_v33 }
 0x6a9   :  { %1968 = vmatpush3.bf16.msra.mxu0 %v1967_v21  ;;  %v972_v21 = vsel %vm971_vm3, %v960_v47, 0.0 }
 0x6aa   :  { %1970 = vmatprep.subr.bf16.mxu0 %v1969_v24  ;;  %2004 = vmatpush3.bf16.msra.mxu1 %v2003_v41  ;;  %v977_v23 = vmax.f32 %v2510_v15, %v972_v21  ;;  %v1504_v15 = vld [vmem:[%s2612_s7 + $0x18] sm:$0xff]  ;;  %v1642_v41 = vld [vmem:[%s2614_s9 + $0x3] ss:$0 sm:$0xff] }
 0x6ab   :  { %2026 = vmatprep.subr.bf16.mxu1 %v2235_v40  ;;  %v2030_v29 = vpack.c.bf16 %v1504_v15, %v1503_v27 }
 0x6ad   :  { %1972 = vmatpush3.bf16.msra.mxu0 %v1971_v28  ;;  %v2027_v28 = vpack.c.bf16 %v1502_v26, %v1501_v25 }
 0x6ae   :  { %2005 = vmatprep.subr.bf16.mxu0 %v2235_v40 }
 0x75f   :  { %v1052_v51 = vpop.f32.mrb[10].mxu0  ;;  %v1194_v52 = vpop.f32.mrb[14].mxu1 }
 0x760   :  { %v1054_v56 = vpop.f32.mrb[11].mxu0  ;;  %v1866_v57 = vpop.f32.mrb[15].mxu1  ;;  %v1198_v61 = vmul.f32 %v1052_v51, %v973_v55  ;;  %v1202_v24 = vmul.f32 %v1194_v52, %v977_v23 }
 0x761   :  { %v1199_v59 = vmul.f32 %v1054_v56, %v974_v53 }
 0x763   :  { %v1123_v0 = vpop.f32.mrb[12].mxu0  ;;  %1354 = vmatprep.mubr.f32.mxu0 %v1199_v59 }
 0x764   :  { %v1125_v3 = vpop.f32.mrb[13].mxu0  ;;  %1355 = vmatmul.mubr.f32.vlgmr.msra.gmra.mrb[14].mxu0 %v1198_v61  ;;  %v1200_v10 = vmul.f32 %v1123_v0, %v975_v2 }
 0x765   :  { %v1201_v8 = vmul.f32 %v1125_v3, %v976_v1  ;;  %2007 = vmatpush3.bf16.msra.mxu0 %v2006_v60  ;;  %1895 = vmatprep.mubr.msk.f32.mxu0 %vm2233_vm13, %v2225_v39 }
 0x766   :  { %2008 = vmatprep.subr.bf16.mxu0 %v2235_v40 }
 0x767   :  { %1424 = vmatprep.mubr.f32.mxu1 %v1201_v8 }
 0x768   :  { %1425 = vmatmul.mubr.f32.vlgmr.msra.gmra.mrb[16].mxu1 %v1200_v10 }
 0x769   :  { %2010 = vmatpush3.bf16.msra.mxu0 %v2009_v4  ;;  %1914 = vmatprep.mubr.msk.f32.mxu1 %vm2233_vm13, %v2225_v39  ;;  %v1279_v39 = vld [vmem:[#allocation8 + $0x260] sm:$0xff] }
 0x76a   :  { %2011 = vmatprep.subr.bf16.mxu0 %v2235_v40  ;;  %v2024_v22 = vpack.c.bf16 %v1280_v20, %v1279_v39  ;;  %2028 = vmatpush3.bf16.msra.mxu1 %v2027_v28 }
 0x76b   :  { %2029 = vmatprep.subr.bf16.mxu1 %v2235_v40 }
 0x76d   :  { %2013 = vmatpush3.bf16.msra.mxu0 %v2012_v7 }
 0x76e   :  { %2014 = vmatprep.subr.bf16.mxu0 %v2235_v40  ;;  %2031 = vmatpush3.bf16.msra.mxu1 %v2030_v29 }
 0x76f   :  { %2032 = vmatprep.subr.bf16.mxu1 %v2235_v40 }
 0x771   :  { %2016 = vmatpush3.bf16.msra.mxu0 %v2015_v9 }
 0x772   :  { %2017 = vmatprep.subr.bf16.mxu0 %v2235_v40  ;;  %2034 = vmatpush3.bf16.msra.mxu1 %v2033_v32 }
 0x773   :  { %2035 = vmatprep.subr.bf16.mxu1 %v2235_v40 }
 0x775   :  { %2019 = vmatpush3.bf16.msra.mxu0 %v2018_v16 }
 0x776   :  { %2020 = vmatprep.subr.bf16.mxu0 %v2235_v40  ;;  %2037 = vmatpush3.bf16.msra.mxu1 %v2036_v35 }
 0x779   :  { %2022 = vmatpush3.bf16.msra.mxu0 %v2021_v19 }
 0x77a   :  { %2023 = vmatprep.subr.bf16.mxu0 %v2235_v40 }
 0x77d   :  { %2025 = vmatpush3.bf16.msra.mxu0 %v2024_v22 }
 0x780   :  { %1896 = vmatmul.mubr.msk.f32.vlgmr.msra.gmra.mrb[16].mxu0 %vm1286_vm4, %v1202_v24 }
 0x837   :  { %v1720_v36 = vpop.f32.mrb[14].mxu0 }
 0x838   :  { %v1721_v37 = vpop.f32.mrb[15].mxu0 }
 0x839   :  { %v1722_v38 = vadd.f32 %v1721_v37, %v1720_v36 }
 0x83b   :  { %v1755_v42 = vpop.f32.mrb[16].mxu1  ;;  %v1357_v40 = vadd.f32 %v1722_v38, %v1642_v41 }
 0x83c   :  { %v1756_v43 = vpop.f32.mrb[17].mxu1 }
 0x83d   :  { %v1757_v44 = vadd.f32 %v1756_v43, %v1755_v42 }
 0x83f   :  { %v1427_v45 = vadd.f32 %v1757_v44, %v1357_v40 }
 0x853   :  { %v1496_v46 = vpop.f32.mrb[16].mxu0 }
 0x854   :  { %v1497_v47 = vadd.f32 %v1496_v46, %v1427_v45  ;;  %v1897_v48 = vpop.f32.mrb[17].mxu0 }
 0x856   :  { %v1500_v49 = vmax.f32 %v1497_v47, 0.0 }
 0x858   :  { %1915 = vmatmul.mubr.msk.f32.vlgmr.msra.gmra.mrb[18].mxu1 %vm1514_vm5, %v1500_v49 }
 0x92b   :  { %v1584_v51 = vpop.f32.mrb[18].mxu1 }
 0x92c   :  { %v1585_v52 = vadd.f32 %v1644_v50, %v1584_v51  ;;  %v1916_v53 = vpop.f32.mrb[19].mxu1 }
 0x92e   :  { %1588 = vst [vmem:[#allocation10] sm:$0x3] %v1585_v52 }
 0x92f   :  { %2196 = shalt.err (!%p2193_p8)
}
 0x930   :  { %s2197_s6 = scalar_lea.hbm %s2615_s10, 32 }
 0x931   :  { %p2198_p9 = scmp.ne.s32.totalorder %s2615_s10, %s2197_s6  ;;  %p2201_p10 = scmp.lt.u32.totalorder %s2197_s6, %s2615_s10 }
 0x933   :  { %p2203_p11 = pnand %p2201_p10, %p2198_p9 }
 0x935   :  { %2206 = shalt.err (!%p2203_p11)
}
 0x936   :  { %1598 = dma.vmem_to_hbm [thread:$0]  %s1596_s27, 32, %s2615_s10, [#allocation4]  }
 0x937   :  { %2213 = dma.done.wait [#allocation4], 32  }
 0x938   :  { %2214 = vsyncadd [#allocation4], 4294967264 }
 0x939   :  { %1602 = vsyncpa [#allocation3], 1 }
 0x93a   :  { %1603 = vsyncpa [#allocation6], 1 }
 0x93b   :  { %1604 = vsyncpa [#allocation9], 1 }
 0x93c   :  { %1605 = vsyncpa [#allocation4], 1 }

</bundles_post_ra>
